<compile_context>
chip_gen: v5e
topology: v5e:2x2
jax: 0.10.0
libtpu: 0.0.40
codegen_flags: <defaults>
</compile_context>

<pallas_src>
import functools

import jax
import jax.numpy as jnp
from jax.experimental import pallas as pl
from jax.experimental.pallas import tpu as pltpu


def _round_up(x, m):
    return (x + m - 1) // m * m


def _pck_loss_kernel(pred_ref, kps_ref, rowloss_ref, idx_ref, *, total_rows, block_rows):
    blk = pl.program_id(0)
    x = pred_ref[...].astype(jnp.float32)    # (tb, C) logits
    k = kps_ref[...].astype(jnp.float32)     # (tb, C) targets in [0, 1]
    tb, C = x.shape

    # --- log-softmax along the lane axis: one exp per element, one log per row ---
    m = jnp.max(x, axis=-1, keepdims=True)                  # (tb, 1) row max (XLU)
    e = jnp.exp(x - m)                                      # (tb, C) EUP
    s = jnp.sum(e, axis=-1, keepdims=True)                  # (tb, 1) XLU
    log_s = jnp.log(s)                                      # (tb, 1) one log per row

    # --- binary cross entropy, each log clamped at -100 (torch BCE behavior) ---
    # log p     = (x - m) - log s
    # log (1-p) = log(s - e) - log s     (s >= e elementwise, so s - e >= 0; log(0) -> -inf
    #                                     which the -100 clamp absorbs, matching torch)
    log_p = jnp.maximum((x - m) - log_s, -100.0)
    log_1mp = jnp.maximum(jnp.log(s - e) - log_s, -100.0)
    bce = -(k * (log_p - log_1mp) + log_1mp)                # (tb, C)

    # --- per-row partial sums; rows past the true batch size (ragged last block) are
    #     garbage and may be NaN/Inf, so use a select (NaN-safe), not a multiply ---
    row = blk * block_rows + jax.lax.broadcasted_iota(jnp.int32, (tb, 1), 0)
    valid = row < total_rows                                # (tb, 1) bool
    rowsum = jnp.sum(bce, axis=-1, keepdims=True)           # (tb, 1)
    rowloss_ref[...] = jnp.where(valid, rowsum, 0.0).reshape(1, tb)

    # --- argmax over logits (first maximal index, matches torch/jnp tie-breaking) ---
    col = jax.lax.broadcasted_iota(jnp.int32, (tb, C), 1)
    idx = jnp.min(jnp.where(x == m, col, jnp.int32(C)), axis=-1)
    idx_ref[...] = idx.reshape(1, tb)


def pck_loss(pred, kps, *, block_rows=None):
    """pred, kps: (B, C). Returns (scalar f32 mean-BCE loss, int32 argmax idx of shape (B,))."""
    B, C = pred.shape
    assert kps.shape == (B, C)

    if block_rows is None:
        # Target ~1 MiB of f32 per input block (the kernel upcasts to f32 internally, and
        # Mosaic keeps several (tb, C) f32 temporaries alive around the lane reductions),
        # so 2 inputs x 2 pipeline buffers + temps stays well under v5e's 16 MiB scoped
        # default and v7x's 64 MiB physical VMEM. For C=128 this is 2048 rows.
        block_rows = max(128, min(2048, (1 << 20) // (4 * C)))

    if B <= 128:
        # Single block; full-extent block shapes are exempt from the (8,128) rule.
        tb = B
    else:
        tb = max(128, _round_up(block_rows, 128))           # lane-dense (1, tb) outputs
        # Keep at least 2 grid blocks so both v7x TensorCores stream HBM.
        tb = min(tb, _round_up(pl.cdiv(B, 2), 128))
    nblk = pl.cdiv(B, tb)

    kernel = functools.partial(_pck_loss_kernel, total_rows=B, block_rows=tb)
    row_loss, idx = pl.pallas_call(
        kernel,
        grid=(nblk,),
        in_specs=[
            pl.BlockSpec((tb, C), lambda b: (b, 0)),
            pl.BlockSpec((tb, C), lambda b: (b, 0)),
        ],
        out_specs=(
            pl.BlockSpec((1, tb), lambda b: (0, b)),
            pl.BlockSpec((1, tb), lambda b: (0, b)),
        ),
        out_shape=(
            jax.ShapeDtypeStruct((1, B), jnp.float32),
            jax.ShapeDtypeStruct((1, B), jnp.int32),
        ),
        compiler_params=pltpu.CompilerParams(
            dimension_semantics=("parallel",),   # independent blocks -> megacore sharding
        ),
    )(pred, kps)

    # Invalid (ragged) rows contribute exactly 0; normalize by the true element count B*C.
    loss = jnp.sum(row_loss) / jnp.float32(B * C)
    return loss, idx[0]


def _reference(pred, kps):
    p = jax.nn.softmax(pred.astype(jnp.float32), axis=1)
    log_p = jnp.maximum(jnp.log(p), -100.0)
    log_1mp = jnp.maximum(jnp.log(1.0 - p), -100.0)
    loss = jnp.mean(-(kps * log_p + (1.0 - kps) * log_1mp))
    return loss, jnp.argmax(p, axis=1).astype(jnp.int32)


if __name__ == "__main__":
    # Small but grid-exercising shape: B keypoint rows, C candidate classes (softmax axis).
    B, C = 300, 128
    key = jax.random.PRNGKey(0)
    k1, k2 = jax.random.split(key)

    pred = jax.random.normal(k1, (B, C), dtype=jnp.float32)
    # one-hot keypoint labels, as the module docstring describes
    label_idx = jax.random.randint(k2, (B,), 0, C)
    kps = jax.nn.one_hot(label_idx, C, dtype=jnp.float32)

    # block_rows=128 so this small example still runs a 3-step grid with a ragged last block.
    loss, idx = pck_loss(pred, kps, block_rows=128)
    jax.block_until_ready((loss, idx))

    ref_loss, ref_idx = _reference(pred, kps)
    assert jnp.allclose(loss, ref_loss, rtol=1e-5, atol=1e-5), (loss, ref_loss)
    assert jnp.array_equal(idx, ref_idx), (idx, ref_idx)

    print("KERNEL_OK")
</pallas_src>

<mosaic_0001>
module attributes {stable_mosaic.version = 11 : i64} {
  func.func @_pck_loss_kernel(%arg0: i32, %arg1: memref<128x128xf32, #tpu.memory_space<vmem>>, %arg2: memref<128x128xf32, #tpu.memory_space<vmem>>, %arg3: memref<1x128xf32, #tpu.memory_space<vmem>>, %arg4: memref<1x128xi32, #tpu.memory_space<vmem>>) attributes {dimension_semantics = [#tpu.dimension_semantics<parallel>], iteration_bounds = array<i64: 3>, scalar_prefetch = 0 : i64, scratch_operands = 0 : i64, tpu.core_type = #tpu.core_type<tc>, window_params = [{transform_indices = @transform_0, window_bounds = array<i64: 128, 128>}, {transform_indices = @transform_1, window_bounds = array<i64: 128, 128>}, {transform_indices = @transform_2, window_bounds = array<i64: 1, 128>}, {transform_indices = @transform_3, window_bounds = array<i64: 1, 128>}]} {
    %c0 = arith.constant 0 : index
    %c0_0 = arith.constant 0 : index
    %0 = vector.load %arg1[%c0, %c0_0] : memref<128x128xf32, #tpu.memory_space<vmem>>, vector<128x128xf32>
    %c0_1 = arith.constant 0 : index
    %c0_2 = arith.constant 0 : index
    %1 = vector.load %arg2[%c0_1, %c0_2] : memref<128x128xf32, #tpu.memory_space<vmem>>, vector<128x128xf32>
    %cst = arith.constant dense<0xFF800000> : vector<128xf32>
    %2 = vector.multi_reduction <maximumf>, %0, %cst [1] : vector<128x128xf32> to vector<128xf32>
    %3 = vector.shape_cast %2 : vector<128xf32> to vector<128x1xf32>
    %4 = vector.broadcast %3 : vector<128x1xf32> to vector<128x128xf32>
    %5 = arith.subf %0, %4 : vector<128x128xf32>
    %6 = math.exp %5 : vector<128x128xf32>
    %cst_3 = arith.constant dense<0.000000e+00> : vector<128xf32>
    %7 = vector.multi_reduction <add>, %6, %cst_3 [1] : vector<128x128xf32> to vector<128xf32>
    %8 = vector.shape_cast %7 : vector<128xf32> to vector<128x1xf32>
    %9 = math.log %8 : vector<128x1xf32>
    %10 = vector.broadcast %3 : vector<128x1xf32> to vector<128x128xf32>
    %11 = arith.subf %0, %10 : vector<128x128xf32>
    %12 = vector.broadcast %9 : vector<128x1xf32> to vector<128x128xf32>
    %13 = arith.subf %11, %12 : vector<128x128xf32>
    %cst_4 = arith.constant -1.000000e+02 : f32
    %14 = vector.broadcast %cst_4 : f32 to vector<128x128xf32>
    %15 = arith.maximumf %13, %14 : vector<128x128xf32>
    %16 = vector.broadcast %8 : vector<128x1xf32> to vector<128x128xf32>
    %17 = arith.subf %16, %6 : vector<128x128xf32>
    %18 = math.log %17 : vector<128x128xf32>
    %19 = vector.broadcast %9 : vector<128x1xf32> to vector<128x128xf32>
    %20 = arith.subf %18, %19 : vector<128x128xf32>
    %cst_5 = arith.constant -1.000000e+02 : f32
    %21 = vector.broadcast %cst_5 : f32 to vector<128x128xf32>
    %22 = arith.maximumf %20, %21 : vector<128x128xf32>
    %23 = arith.subf %15, %22 : vector<128x128xf32>
    %24 = arith.mulf %1, %23 : vector<128x128xf32>
    %25 = arith.addf %24, %22 : vector<128x128xf32>
    %cst_6 = arith.constant 0.000000e+00 : f32
    %26 = vector.broadcast %cst_6 : f32 to vector<128x128xf32>
    %27 = arith.subf %26, %25 : vector<128x128xf32>
    %c128_i32 = arith.constant 128 : i32
    %28 = arith.muli %arg0, %c128_i32 : i32
    %29 = tpu.iota {dimensions = array<i32: 0>} : vector<128x1xi32>
    %30 = vector.broadcast %28 : i32 to vector<128x1xi32>
    %31 = arith.addi %30, %29 : vector<128x1xi32>
    %c300_i32 = arith.constant 300 : i32
    %32 = vector.broadcast %c300_i32 : i32 to vector<128x1xi32>
    %33 = arith.cmpi slt, %31, %32 : vector<128x1xi32>
    %cst_7 = arith.constant dense<0.000000e+00> : vector<128xf32>
    %34 = vector.multi_reduction <add>, %27, %cst_7 [1] : vector<128x128xf32> to vector<128xf32>
    %35 = vector.shape_cast %34 : vector<128xf32> to vector<128x1xf32>
    %cst_8 = arith.constant 0.000000e+00 : f32
    %36 = vector.broadcast %cst_8 : f32 to vector<128x1xf32>
    %37 = arith.select %33, %35, %36 : vector<128x1xi1>, vector<128x1xf32>
    %38 = vector.shape_cast %37 : vector<128x1xf32> to vector<1x128xf32>
    %c0_9 = arith.constant 0 : index
    %c0_10 = arith.constant 0 : index
    %39 = vector.load %arg3[%c0_9, %c0_10] : memref<1x128xf32, #tpu.memory_space<vmem>>, vector<1x128xf32>
    tpu.vector_store %arg3[%c0_9, %c0_10], %38 {strides = array<i32>} : memref<1x128xf32, #tpu.memory_space<vmem>>, vector<1x128xf32>,
    %40 = tpu.iota {dimensions = array<i32: 1>} : vector<128x128xi32>
    %41 = vector.broadcast %3 : vector<128x1xf32> to vector<128x128xf32>
    %42 = arith.cmpf oeq, %0, %41 : vector<128x128xf32>
    %c128_i32_11 = arith.constant 128 : i32
    %43 = vector.broadcast %c128_i32_11 : i32 to vector<128x128xi32>
    %44 = arith.select %42, %40, %43 : vector<128x128xi1>, vector<128x128xi32>
    %cst_12 = arith.constant dense<2147483647> : vector<128xi32>
    %45 = vector.multi_reduction <minsi>, %44, %cst_12 [1] : vector<128x128xi32> to vector<128xi32>
    %46 = vector.shape_cast %45 : vector<128xi32> to vector<1x128xi32>
    %c0_13 = arith.constant 0 : index
    %c0_14 = arith.constant 0 : index
    %47 = vector.load %arg4[%c0_13, %c0_14] : memref<1x128xi32, #tpu.memory_space<vmem>>, vector<1x128xi32>
    tpu.vector_store %arg4[%c0_13, %c0_14], %46 {strides = array<i32>} : memref<1x128xi32, #tpu.memory_space<vmem>>, vector<1x128xi32>,
    return
  }
  func.func @transform_0(%arg0: i32) -> (i32, i32) {
    %c0_i32 = arith.constant 0 : i32
    %c0_i32_0 = arith.constant 0 : i32
    return %arg0, %c0_i32 : i32, i32
  }
  func.func @transform_1(%arg0: i32) -> (i32, i32) {
    %c0_i32 = arith.constant 0 : i32
    %c0_i32_0 = arith.constant 0 : i32
    return %arg0, %c0_i32 : i32, i32
  }
  func.func @transform_2(%arg0: i32) -> (i32, i32) {
    %c0_i32 = arith.constant 0 : i32
    %c0_i32_0 = arith.constant 0 : i32
    return %c0_i32, %arg0 : i32, i32
  }
  func.func @transform_3(%arg0: i32) -> (i32, i32) {
    %c0_i32 = arith.constant 0 : i32
    %c0_i32_0 = arith.constant 0 : i32
    return %c0_i32, %arg0 : i32, i32
  }
}

</mosaic_0001>

<bundles_post_ra>
// kernel: tpu_custom_call.1
= control target key start
LH: loop header
LB: loop body
LE: loop exit
PB: predicated region body
PF: predicated region fallthrough
CT: control target
= control target key end

     0   :  { %9 = vsyncpa [#allocation3], 0  ;;  %s2555_s0 = inlined_call_operand.hbm [shape: f32[300,128], index: 0, kind: input, shape index: {}]   ;;  %s2556_s1 = inlined_call_operand.hbm [shape: f32[300,128], index: 1, kind: input, shape index: {}]   ;;  %s2557_s2 = inlined_call_operand.hbm [shape: f32[1,300], index: 2, kind: output, shape index: {0}]   ;;  %s2558_s3 = inlined_call_operand.hbm [shape: s32[1,300], index: 3, kind: output, shape index: {1}]  }
   0x1   :  { %11 = vsyncpa [#allocation3 + $0x1], 0 }
   0x2   :  { %12 = vsyncpa [#allocation6], 0 }
   0x3   :  { %14 = vsyncpa [#allocation6 + $0x1], 0 }
   0x4   :  { %15 = vsyncpa [#allocation4], 0 }
   0x5   :  { %17 = vsyncpa [#allocation4 + $0x1], 0 }
   0x6   :  { %18 = vsyncpa [#allocation9], 0 }
   0x7   :  { %20 = vsyncpa [#allocation9 + $0x1], 0  ;;  %s1612_s12 = smov 0   ;;  %s1614_s13 = smov 0  }
   0x8   :  { %s1616_s14 = smov 0   ;;  %s1618_s15 = smov 0  }
   0x9 LB: > { %s1633_s16 = sadd.s32 4294967295, %s1584_s15   ;;  %s1233_s17 = sadd.s32 4294967294, %s1584_s15   ;;  %s1584_s15 = sphi %s1618_s15, %s2617_s15   ;;  %s1580_s14 = sphi %s1616_s14, %s2616_s14   ;;  %s1576_s13 = sphi %s1614_s13, %s2615_s13   ;;  %s1572_s12 = sphi %s1612_s12, %s2614_s12  }
   0xa   : > { %s1637_s18 = sadd.s32 1, %s1584_s15   ;;  %s33_s19 = sadd.s32 1, %s1580_s14 }
   0xb   : > { %s30_s20 = ssub.s32 %s1584_s15, %s1637_s18  ;;  %p40_p0 = scmp.ne.s32.totalorder %s1580_s14, %s1576_s13 }
   0xc   : > { %p31_p1 = scmp.eq.s32.totalorder %s30_s20, 0  ;;  %p41_p2 = scmp.eq.s32.totalorder %s1584_s15, 0 }
   0xd   : > { %p46_p3 = scmp.ne.s32.totalorder %s1576_s13, %s1572_s12  ;;  %p47_p4 = scmp.eq.s32.totalorder %s1633_s16, 0 }
   0xe   : > { %s1649_s21 = scalar_select %p31_p1, %s1580_s14, %s33_s19  }
   0xf   : > { %p1651_p5 = por %p41_p2, %p40_p0  ;;  %p1655_p6 = por %p47_p4, %p46_p3 }
  0x10   : > { %p96_p7 = scmp.eq.s32.totalorder %s1633_s16, 2  ;;  %p102_p8 = scmp.eq.s32.totalorder %s1233_s17, 2 }
  0x11   : > { %p1235_p11 = scmp.ge.s32.totalorder %s1584_s15, 3 }
  0x12   : > { %p1660_p9 = por %p96_p7, %p40_p0  ;;  %p1664_p10 = por %p102_p8, %p46_p3 }
  0x13   : > { %144 = sbr.rel (%p1235_p11) target bundleno = 96 (0x60), region = 16 }
  0x14   : > { %s2580_s25 = scalar_select %p1664_p10, 1, 0 }
  0x18   : > { %147 = sbr.rel (!%p1651_p5) target bundleno = 60 (0x3c), region = 20  ;;  %s148_s26 = sand.u32 (%p1651_p5), 1, %s1580_s14  }
  0x19   : > { %s1237_s27 = sshll.u32 (%p1651_p5), %s1584_s15, 4  ;;  %s1236_s28 = sshll.u32 (%p1651_p5), %s148_s26, 7 }
  0x1a   : > { %s154_s29 = ssub.s32 (%p1651_p5), 38, %s1237_s27  ;;  %s1676_s6 = scalar_lea.sflag (%p1651_p5), [#allocation3], %s148_s26 }
  0x1b   : > { %p155_p12 = scmp.lt.s32.totalorder (%p1651_p5), %s154_s29, 16  ;;  %s152_s7 = scalar_lea.vmem (%p1651_p5), [#allocation2], %s1236_s28 }
  0x1d   : > { %s2619_s29 = smov (!%p155_p12, %s154_s29), 16 }
  0x1e   : > { %s1238_s30 = sshll.u32 %s2619_s29, 3 }
  0x1f   : > { %s158_s4 = ssub.s32 128, %s1238_s30 }
  0x20   : > { %s159_s5 = sshll.u32 %s158_s4, 4 }
  0x21   : > { %160 = vsyncadd %s1676_s6, %s159_s5  ;;  %p1679_p13 = scmp.ne.s32.totalorder %s1238_s30, 0  ;;  %s1256_s9 = sshll.u32 %s1584_s15, 7 }
  0x22   : > { %s163_s17 = scalar_lea.hbm %s2555_s0, %s1256_s9  ;;  %s1687_s19 = sshll.u32 %s152_s7, 4  ;;  %s168_s19 = int_to_ptr.vmem [resolvable:$true] %s1687_s19 }
  0x23   : > { %s165_s20 = sshll.u32 %s163_s17, 4  ;;  %s1242_s26 = sshll.u32 %s2619_s29, 7  ;;  %s1690_s20 = int_to_ptr.hbm [resolvable:$true] %s165_s20 }
  0x24   : > { %s1404_s27 = sshra.s32 %s1690_s20, 4  ;;  %s1406_s28 = sshrl.u32 %s1242_s26, 4  ;;  %s1405_s27 = int_to_ptr.hbm [resolvable:$true] %s1404_s27 }
  0x25   : > { %s1411_s30 = scalar_lea.hbm %s1405_s27, %s1406_s28  ;;  %s1415_s7 = scalar_lea.hbm %s2555_s0, 304 }
  0x26   : > { %p1412_p0 = scmp.ne.s32.totalorder %s1405_s27, %s1411_s30  ;;  %p1416_p3 = scmp.lt.s32.totalorder %s1405_s27, %s2555_s0 }
  0x27   : > { %p1417_p4 = scmp.lt.s32.totalorder %s1415_s7, %s1411_s30 }
  0x28   : > { %p1413_p1 = pnand %p1412_p0, %p1679_p13 }
  0x29   : > { %p1418_p7 = por %p1417_p4, %p1416_p3 }
  0x2a   : > { %p1414_p2 = pneg %p1413_p1 }
  0x2c   : > { %p1419_p8 = pnand %p1418_p7, %p1414_p2 }
  0x2e   : > { %1422 = shalt.err (!%p1419_p8)
}
  0x2f   : > { %s1423_s11 = sshra.s32 %s168_s19, 4  ;;  %s1586_s4 = smov [#allocation2]   ;;  %s1424_s11 = int_to_ptr.vmem [resolvable:$true] %s1423_s11 }
  0x30   : > { %s1430_s17 = scalar_lea.vmem %s1424_s11, %s1406_s28  ;;  %s1434_s5 = scalar_lea.vmem %s1586_s4, 256 }
  0x31   : > { %p1431_p11 = scmp.ne.s32.totalorder %s1424_s11, %s1430_s17  ;;  %p1436_p1 = scmp.lt.s32.totalorder %s1434_s5, %s1430_s17 }
  0x33   : > { %p1432_p12 = pnand %p1431_p11, %p1679_p13 }
  0x35   : > { %p1433_p0 = pneg %p1432_p12 }
  0x37   : > { %p1438_p10 = pnand %p1436_p1, %p1433_p0 }
  0x39   : > { %1441 = shalt.err (!%p1438_p10)
}
  0x3a   : > { %s1587_s27 = smov 128   ;;  %s1588_s30 = smov 8  }
  0x3b   : > { %173 = dma.hbm_to_vmem [thread:$0]  (%p1679_p13), %s1690_s20, %s1242_s26, %s168_s19, %s1676_s6, %s1587_s27, %s1587_s27, %s1588_s30  }
  0x3c PF: > { %176 = sbr.rel (!%p1651_p5) target bundleno = 96 (0x60), region = 24  ;;  %s177_s28 = sand.u32 (%p1651_p5), 1, %s1580_s14  }
  0x3d   : > { %s1244_s7 = sshll.u32 (%p1651_p5), %s1584_s15, 4  ;;  %s1243_s9 = sshll.u32 (%p1651_p5), %s177_s28, 7 }
  0x3e   : > { %s183_s10 = ssub.s32 (%p1651_p5), 38, %s1244_s7  ;;  %s1723_s4 = scalar_lea.sflag (%p1651_p5), [#allocation6], %s177_s28 }
  0x3f   : > { %p184_p10 = scmp.lt.s32.totalorder (%p1651_p5), %s183_s10, 16  ;;  %s181_s29 = scalar_lea.vmem (%p1651_p5), [#allocation5], %s1243_s9 }
  0x41   : > { %s2621_s10 = smov (!%p184_p10, %s183_s10), 16 }
  0x42   : > { %s1245_s11 = sshll.u32 %s2621_s10, 3 }
  0x43   : > { %s187_s17 = ssub.s32 128, %s1245_s11 }
  0x44   : > { %s188_s8 = sshll.u32 %s187_s17, 4 }
  0x45   : > { %189 = vsyncadd %s1723_s4, %s188_s8  ;;  %p1726_p5 = scmp.ne.s32.totalorder %s1245_s11, 0  ;;  %s1257_s6 = sshll.u32 %s1584_s15, 7 }
  0x46   : > { %s192_s26 = scalar_lea.hbm %s2556_s1, %s1257_s6  ;;  %s1734_s5 = sshll.u32 %s181_s29, 4  ;;  %s197_s5 = int_to_ptr.vmem [resolvable:$true] %s1734_s5 }
  0x47   : > { %s194_s27 = sshll.u32 %s192_s26, 4  ;;  %s1249_s30 = sshll.u32 %s2621_s10, 7  ;;  %s1737_s27 = int_to_ptr.hbm [resolvable:$true] %s194_s27 }
  0x48   : > { %s1443_s28 = sshra.s32 %s1737_s27, 4  ;;  %s1445_s7 = sshrl.u32 %s1249_s30, 4  ;;  %s1444_s28 = int_to_ptr.hbm [resolvable:$true] %s1443_s28 }
  0x49   : > { %s1450_s9 = scalar_lea.hbm %s1444_s28, %s1445_s7  ;;  %s1454_s8 = scalar_lea.hbm %s2556_s1, 304 }
  0x4a   : > { %p1451_p13 = scmp.ne.s32.totalorder %s1444_s28, %s1450_s9  ;;  %p1455_p4 = scmp.lt.s32.totalorder %s1444_s28, %s2556_s1 }
  0x4b   : > { %p1456_p7 = scmp.lt.s32.totalorder %s1454_s8, %s1450_s9 }
  0x4c   : > { %p1452_p2 = pnand %p1451_p13, %p1726_p5 }
  0x4d   : > { %p1457_p8 = por %p1456_p7, %p1455_p4 }
  0x4e   : > { %p1453_p3 = pneg %p1452_p2 }
  0x50   : > { %p1458_p11 = pnand %p1457_p8, %p1453_p3 }
  0x52   : > { %1461 = shalt.err (!%p1458_p11)
}
  0x53   : > { %s1462_s19 = sshra.s32 %s197_s5, 4  ;;  %s1589_s26 = smov [#allocation5]   ;;  %s1463_s19 = int_to_ptr.vmem [resolvable:$true] %s1462_s19 }
  0x54   : > { %s1469_s20 = scalar_lea.vmem %s1463_s19, %s1445_s7  ;;  %s1473_s11 = scalar_lea.vmem %s1589_s26, 256 }
  0x55   : > { %p1470_p12 = scmp.ne.s32.totalorder %s1463_s19, %s1469_s20  ;;  %p1475_p10 = scmp.lt.s32.totalorder %s1473_s11, %s1469_s20 }
  0x57   : > { %p1471_p0 = pnand %p1470_p12, %p1726_p5 }
  0x59   : > { %p1472_p1 = pneg %p1471_p0 }
  0x5b   : > { %p1477_p13 = pnand %p1475_p10, %p1472_p1 }
  0x5d   : > { %1480 = shalt.err (!%p1477_p13)
}
  0x5e   : > { %s1590_s28 = smov 128   ;;  %s1591_s9 = smov 8  }
  0x5f   : > { %202 = dma.hbm_to_vmem [thread:$0]  (%p1726_p5), %s1737_s27, %s1249_s30, %s197_s5, %s1723_s4, %s1590_s28, %s1590_s28, %s1591_s9  }
  0x60 PF: > { %p1250_p2 = scmp.ge.s32.totalorder %s1584_s15, 1  ;;  %p204_p3 = scmp.lt.s32.totalorder %s1584_s15, 4 }
  0x62   : > { %p205_p4 = pnand %p1250_p2, %p204_p3 }
  0x64   : > { %208 = sbr.rel (%p205_p4) target bundleno = 605 (0x25d), region = 28 }
  0x69   : > { %s1766_s7 = sand.u32 1, %s1576_s13  }
  0x6a   : > { %s1251_s17 = sshll.u32 %s1766_s7, 7  ;;  %s211_s8 = scalar_lea.sflag [#allocation3], %s1766_s7 }
  0x6b   : > { %s1770_s22 = scalar_lea.vmem [#allocation2], %s1251_s17 }
  0x6c   : > { %1555 = dma.done.wait (%p1655_p6), %s211_s8, 2048  }
  0x6d   : > { %1557 = vsyncadd (%p1655_p6), %s211_s8, 4294965248  ;;  %s221_s10 = scalar_lea.sflag [#allocation6], %s1766_s7  ;;  %s1777_s4 = scalar_lea.vmem [#allocation5], %s1251_s17 }
  0x6e   : > { %1559 = dma.done.wait (%p1655_p6), %s221_s10, 2048  }
  0x6f   : > { %1561 = vsyncadd (%p1655_p6), %s221_s10, 4294965248  ;;  %v1784_v0 = vld [vmem:[%s1770_s22 + $0x20] sm:$0xff]  ;;  %v1787_v1 = vld [vmem:[%s1770_s22 + $0x10] sm:$0xff]  ;;  %v2559_v16 = vlaneseq  ;;  %s1253_s23 = sshll.u32 %s1633_s16, 7  ;;  %s1099_s30 = scalar_lea.hbm %s2557_s2, %s1633_s16 }
  0x70   : > { %v1790_v2 = vld [vmem:[%s1770_s22] sm:$0xff]  ;;  %306 = vmax.xlane.f32.xlu2 %v1784_v0  ;;  %302 = vmax.xlane.f32.xlu1 %v1787_v1  ;;  %v1796_v3 = vld [vmem:[%s1770_s22 + $0x28] sm:$0xff]  ;;  %v1799_v4 = vld [vmem:[%s1770_s22 + $0x18] sm:$0xff]  ;;  %s1112_s19 = scalar_lea.hbm %s2558_s3, %s1633_s16  ;;  %s249_s20 = scalar_lea.vmem [#allocation7], %s1766_s7 }
  0x71   : > { %298 = vmax.xlane.f32.xlu0 %v1790_v2  ;;  %v1802_v5 = vld [vmem:[%s1770_s22 + $0x8] sm:$0xff]  ;;  %v1808_v6 = vld [vmem:[%s1770_s22 + $0x40] sm:$0xff]  ;;  %v1811_v7 = vld [vmem:[%s1770_s22 + $0x38] sm:$0xff]  ;;  %v1848_v17 = vand.u32 127, %v2559_v16  ;;  %s2491_s26 = sshll.u32 %s249_s20, 4  ;;  %s2493_s11 = sshll.u32 %s1099_s30, 4  ;;  %s1102_s26 = int_to_ptr.vmem [resolvable:$true] %s2491_s26  ;;  %s1104_s11 = int_to_ptr.hbm [resolvable:$true] %s2493_s11 }
  0x72   : > { %v1814_v8 = vld [vmem:[%s1770_s22 + $0x30] sm:$0xff]  ;;  %v1820_v9 = vld [vmem:[%s1770_s22 + $0x58] sm:$0xff]  ;;  %v1826_v11 = vld [vmem:[%s1770_s22 + $0x48] sm:$0xff]  ;;  %s255_s28 = scalar_lea.vmem [#allocation8], %s1766_s7  ;;  %s2500_s9 = sshll.u32 %s1112_s19, 4  ;;  %s1117_s9 = int_to_ptr.hbm [resolvable:$true] %s2500_s9 }
  0x73   : > { %v1823_v10 = vld [vmem:[%s1770_s22 + $0x50] sm:$0xff]  ;;  %v1835_v13 = vld [vmem:[%s1770_s22 + $0x68] sm:$0xff]  ;;  %v1838_v14 = vld [vmem:[%s1770_s22 + $0x60] sm:$0xff]  ;;  %2583 = vst [vmem:[#allocation14_spill] sm:$0xff] %v1848_v17  ;;  %s2498_s16 = sshll.u32 %s255_s28, 4  ;;  %s1087_s17 = scalar_lea.sflag [#allocation4], %s1766_s7  ;;  %s1115_s16 = int_to_ptr.vmem [resolvable:$true] %s2498_s16 }
  0x74   : > { %v1832_v12 = vld [vmem:[%s1770_s22 + $0x70] sm:$0xff]  ;;  %v1844_v15 = vld [vmem:[%s1770_s22 + $0x78] sm:$0xff]  ;;  %s1496_s8 = sshra.s32 %s1104_s11, 4  ;;  %s1497_s8 = int_to_ptr.hbm [resolvable:$true] %s1496_s8 }
  0x75   : > { %s1498_s22 = scalar_lea.hbm %s1497_s8, 1  ;;  %p1503_p8 = scmp.lt.s32.totalorder %s1497_s8, %s2557_s2 }
  0x76   : > { %p1499_p6 = scmp.ne.s32.totalorder %s1497_s8, %s1498_s22 }
  0x78   : > { %308 = vmax.xlane.f32.xlu2 %v1796_v3  ;;  %304 = vmax.xlane.f32.xlu1 %v1799_v4  ;;  %p1500_p5 = pnand %p1499_p6, %p1660_p9 }
  0x79   : > { %300 = vmax.xlane.f32.xlu0 %v1802_v5 }
  0x7a   : > { %p1501_p7 = pneg %p1500_p5 }
  0x80   : > { %314 = vmax.xlane.f32.xlu2 %v1808_v6  ;;  %312 = vmax.xlane.f32.xlu1 %v1811_v7 }
  0x81   : > { %310 = vmax.xlane.f32.xlu0 %v1814_v8 }
  0x88   : > { %320 = vmax.xlane.f32.xlu2 %v1820_v9  ;;  %318 = vmax.xlane.f32.xlu1 %v1823_v10 }
  0x89   : > { %316 = vmax.xlane.f32.xlu0 %v1826_v11 }
  0x90   : > { %326 = vmax.xlane.f32.xlu2 %v1832_v12  ;;  %324 = vmax.xlane.f32.xlu1 %v1835_v13 }
  0x91   : > { %322 = vmax.xlane.f32.xlu0 %v1838_v14 }
  0x99   : > { %328 = vmax.xlane.f32.xlu0 %v1844_v15 }
  0xe3   : > { %v1850_v18 = vpop.xlane.xlu2 %306  ;;  %v1852_v19 = vpop.xlane.xlu1 %302 }
  0xe4   : > { %vm800_vm0 = vcmp.eq.f32.partialorder %v1787_v1, %v1852_v19  ;;  %v1856_v20 = vpop.xlane.xlu0 %298  ;;  %vm802_vm4 = vcmp.eq.f32.partialorder %v1784_v0, %v1850_v18 }
  0xe5   : > { %v1859_v21 = vsel %vm800_vm0, %v1848_v17, 128  ;;  %vm798_vm1 = vcmp.eq.f32.partialorder %v1790_v2, %v1856_v20  ;;  %v1901_v36 = vsel %vm802_vm4, %v1848_v17, 128 }
  0xe6   : > { %v1864_v22 = vsel %vm798_vm1, %v1848_v17, 128  ;;  %v859_v23 = vshra.s32 %v1859_v21, 16  ;;  %v887_v41 = vshra.s32 %v1901_v36, 16 }
  0xe7   : > { %v831_v24 = vshra.s32 %v1864_v22, 16 }
  0xe8   : > { %v1868_v25 = vcvt.s32.f32 %v859_v23  ;;  %v1932_v47 = vcvt.s32.f32 %v887_v41  ;;  %v1978_v23 = vsub.f32 %v1787_v1, %v1852_v19 }
  0xe9   : > { %v1870_v26 = vcvt.s32.f32 %v831_v24 }
  0xea   : > { %862 = vmin.xlane.f32.xlu0 %v1868_v25  ;;  %2585 = vst [vmem:[#allocation16_spill] sm:$0xff] %v1978_v23 }
  0xeb   : > { %834 = vmin.xlane.f32.xlu1 %v1870_v26  ;;  %v1874_v27 = vpop.xlane.xlu2 %308  ;;  %v1876_v28 = vpop.xlane.xlu1 %304 }
  0xec   : > { %vm803_vm2 = vcmp.eq.f32.partialorder %v1796_v3, %v1874_v27  ;;  %vm801_vm3 = vcmp.eq.f32.partialorder %v1799_v4, %v1876_v28  ;;  %v1882_v29 = vpop.xlane.xlu0 %300 }
  0xed   : > { %v1887_v30 = vsel %vm803_vm2, %v1848_v17, 128  ;;  %v1890_v31 = vsel %vm801_vm3, %v1848_v17, 128  ;;  %vm799_vm5 = vcmp.eq.f32.partialorder %v1802_v5, %v1882_v29 }
  0xee   : > { %v1895_v32 = vsel %vm799_vm5, %v1848_v17, 128  ;;  %v901_v33 = vshra.s32 %v1887_v30, 16  ;;  %v873_v34 = vshra.s32 %v1890_v31, 16 }
  0xef   : > { %v845_v35 = vshra.s32 %v1895_v32, 16 }
  0xf0   : > { %v1903_v37 = vcvt.s32.f32 %v901_v33  ;;  %v1905_v38 = vcvt.s32.f32 %v873_v34 }
  0xf1   : > { %v1907_v39 = vcvt.s32.f32 %v845_v35 }
  0xf2   : > { %904 = vmin.xlane.f32.xlu0 %v1903_v37 }
  0xf3   : > { %876 = vmin.xlane.f32.xlu1 %v1905_v38  ;;  %848 = vmin.xlane.f32.xlu2 %v1907_v39  ;;  %v1912_v40 = vpop.xlane.xlu2 %314  ;;  %v1915_v42 = vpop.xlane.xlu1 %312 }
  0xf4   : > { %vm806_vm6 = vcmp.eq.f32.partialorder %v1808_v6, %v1912_v40  ;;  %v1919_v43 = vpop.xlane.xlu0 %310  ;;  %vm805_vm8 = vcmp.eq.f32.partialorder %v1811_v7, %v1915_v42 }
  0xf5   : > { %v1922_v44 = vsel %vm806_vm6, %v1848_v17, 128  ;;  %vm804_vm7 = vcmp.eq.f32.partialorder %v1814_v8, %v1919_v43  ;;  %v1938_v50 = vsel %vm805_vm8, %v1848_v17, 128 }
  0xf6   : > { %v1929_v45 = vsel %vm804_vm7, %v1848_v17, 128  ;;  %v943_v46 = vshra.s32 %v1922_v44, 16  ;;  %v929_v53 = vshra.s32 %v1938_v50, 16 }
  0xf7   : > { %v915_v48 = vshra.s32 %v1929_v45, 16 }
  0xf8   : > { %v1935_v49 = vcvt.s32.f32 %v943_v46  ;;  %v1965_v59 = vcvt.s32.f32 %v929_v53  ;;  %v350_v46 = vmul.f32 1.442695, %v1978_v23 }
  0xf9   : > { %v1940_v51 = vcvt.s32.f32 %v915_v48 }
  0xfa   : > { %946 = vmin.xlane.f32.xlu0 %v1935_v49  ;;  %1308 = vpow2.f32 %v350_v46 }
  0xfb   : > { %890 = vmin.xlane.f32.xlu2 %v1932_v47  ;;  %918 = vmin.xlane.f32.xlu1 %v1940_v51  ;;  %v1945_v52 = vpop.xlane.xlu2 %320  ;;  %v1948_v54 = vpop.xlane.xlu1 %318 }
  0xfc   : > { %vm809_vm9 = vcmp.eq.f32.partialorder %v1820_v9, %v1945_v52  ;;  %v1952_v55 = vpop.xlane.xlu0 %316  ;;  %vm808_vm11 = vcmp.eq.f32.partialorder %v1823_v10, %v1948_v54 }
  0xfd   : > { %v1955_v56 = vsel %vm809_vm9, %v1848_v17, 128  ;;  %vm807_vm10 = vcmp.eq.f32.partialorder %v1826_v11, %v1952_v55  ;;  %v1971_v62 = vsel %vm808_vm11, %v1848_v17, 128 }
  0xfe   : > { %v1962_v57 = vsel %vm807_vm10, %v1848_v17, 128  ;;  %v985_v58 = vshra.s32 %v1955_v56, 16  ;;  %2584 = vst [vmem:[#allocation15_spill] sm:$0xff] %v1971_v62  ;;  %v971_v33 = vshra.s32 %v1971_v62, 16  ;;  %v2015_v62 = vsub.f32 %v1790_v2, %v1856_v20 }
  0xff   : > { %v957_v60 = vshra.s32 %v1962_v57, 16 }
 0x100   : > { %v1968_v61 = vcvt.s32.f32 %v985_v58  ;;  %v2003_v48 = vcvt.s32.f32 %v971_v33  ;;  %v2020_v33 = vsub.f32 %v1796_v3, %v1874_v27  ;;  %v346_v2 = vmul.f32 1.442695, %v2015_v62 }
 0x101   : > { %v1973_v63 = vcvt.s32.f32 %v957_v60 }
 0x102   : > { %988 = vmin.xlane.f32.xlu0 %v1968_v61  ;;  %v356_v20 = vmul.f32 1.442695, %v2020_v33  ;;  %1310 = vpow2.f32 %v346_v2 }
 0x103   : > { %932 = vmin.xlane.f32.xlu2 %v1965_v59  ;;  %960 = vmin.xlane.f32.xlu1 %v1973_v63  ;;  %v1982_v24 = vpop.xlane.xlu2 %326  ;;  %v1985_v34 = vpop.xlane.xlu1 %324 }
 0x104   : > { %vm812_vm12 = vcmp.eq.f32.partialorder %v1832_v12, %v1982_v24  ;;  %v1989_v35 = vpop.xlane.xlu0 %322  ;;  %vm811_vm14 = vcmp.eq.f32.partialorder %v1835_v13, %v1985_v34  ;;  %1312 = vpow2.f32 %v356_v20 }
 0x105   : > { %v1992_v41 = vsel %vm812_vm12, %v1848_v17, 128  ;;  %vm810_vm13 = vcmp.eq.f32.partialorder %v1838_v14, %v1989_v35  ;;  %v2009_v60 = vsel %vm811_vm14, %v1848_v17, 128 }
 0x106   : > { %v1999_v1 = vsel %vm810_vm13, %v1848_v17, 128  ;;  %v1027_v19 = vshra.s32 %v1992_v41, 16  ;;  %2586 = vst [vmem:[#allocation17_spill] sm:$0xff] %v2009_v60 }
 0x107   : > { %v999_v53 = vshra.s32 %v1999_v1, 16 }
 0x108   : > { %v2006_v58 = vcvt.s32.f32 %v1027_v19  ;;  %v1013_v19 = vshra.s32 %v2009_v60, 16 }
 0x109   : > { %v2011_v16 = vcvt.s32.f32 %v999_v53  ;;  %v2027_v53 = vsub.f32 %v1802_v5, %v1882_v29  ;;  %v2042_v5 = vpop.eup %1308 }
 0x10a   : > { %1030 = vmin.xlane.f32.xlu0 %v2006_v58  ;;  %v2038_v27 = vcvt.s32.f32 %v1013_v19  ;;  %v2053_v19 = vsub.f32 %v1808_v6, %v1912_v40  ;;  %v2063_v2 = vpop.eup %1310  ;;  %v2072_v40 = vsub.f32 %v1814_v8, %v1919_v43 }
 0x10b   : > { %2587 = vst [vmem:[#allocation18_spill] sm:$0xff] %v2011_v16  ;;  %974 = vmin.xlane.f32.xlu2 %v2003_v48  ;;  %1002 = vmin.xlane.f32.xlu1 %v2011_v16  ;;  %v348_v60 = vmul.f32 1.442695, %v2027_v53  ;;  %v2048_v16 = vsub.f32 %v1784_v0, %v1850_v18 }
 0x10c   : > { %v2029_v23 = vpop.xlane.xlu0 %328  ;;  %v362_v18 = vmul.f32 1.442695, %v2053_v19 }
 0x10d   : > { %vm813_vm15 = vcmp.eq.f32.partialorder %v1844_v15, %v2029_v23  ;;  %1314 = vpow2.f32 %v348_v60  ;;  %v354_v0 = vmul.f32 1.442695, %v2048_v16  ;;  %v358_v60 = vmul.f32 1.442695, %v2072_v40 }
 0x10e   : > { %v2035_v3 = vsel %vm813_vm15, %v1848_v17, 128  ;;  %v2066_v17 = vpop.eup %1312 }
 0x10f   : > { %v1041_v46 = vshra.s32 %v2035_v3, 16  ;;  %1316 = vpow2.f32 %v354_v0 }
 0x110   : > { %1318 = vpow2.f32 %v362_v18 }
 0x111   : > { %v2044_v29 = vcvt.s32.f32 %v1041_v46  ;;  %v2059_v46 = vsub.f32 %v1799_v4, %v1876_v28  ;;  %v2077_v4 = vsub.f32 %v1820_v9, %v1945_v52  ;;  %v2083_v28 = vsub.f32 %v1811_v7, %v1915_v42 }
 0x112   : > { %382 = vadd.xlane.f32.xlu0 %v2042_v5  ;;  %v2096_v52 = vsub.f32 %v1826_v11, %v1952_v55  ;;  %v2101_v7 = vsub.f32 %v1832_v12, %v1982_v24  ;;  %v2107_v42 = vsub.f32 %v1823_v10, %v1948_v54  ;;  %v2121_v10 = vsub.f32 %v1838_v14, %v1989_v35 }
 0x113   : > { %1016 = vmin.xlane.f32.xlu2 %v2038_v27  ;;  %1044 = vmin.xlane.f32.xlu1 %v2044_v29  ;;  %v352_v20 = vmul.f32 1.442695, %v2059_v46  ;;  %v2068_v6 = vpop.eup %1314  ;;  %v368_v8 = vmul.f32 1.442695, %v2077_v4  ;;  %v360_v0 = vmul.f32 1.442695, %v2083_v28  ;;  %v2127_v54 = vsub.f32 %v1835_v13, %v1985_v34 }
 0x114   : > { %2588 = vst [vmem:[#allocation19_spill] sm:$0xff] %v2096_v52  ;;  %v374_v11 = vmul.f32 1.442695, %v2101_v7  ;;  %v370_v24 = vmul.f32 1.442695, %v2121_v10  ;;  %v2142_v13 = vsub.f32 %v1844_v15, %v2029_v23  ;;  %v830_v15 = vand.u32 65535, %v1864_v22 }
 0x115   : > { %1320 = vpow2.f32 %v352_v20  ;;  %v2087_v43 = vpop.eup %1316  ;;  %2589 = vst [vmem:[#allocation20_spill] sm:$0xff] %v2101_v7  ;;  %v364_v20 = vmul.f32 1.442695, %v2096_v52  ;;  %v872_v22 = vand.u32 65535, %v1890_v31 }
 0x116   : > { %v2090_v18 = vpop.eup %1318  ;;  %1322 = vpow2.f32 %v358_v60  ;;  %v366_v60 = vmul.f32 1.442695, %v2107_v42  ;;  %2590 = vst [vmem:[#allocation21_spill] sm:$0xff] %v2121_v10  ;;  %v376_v14 = vmul.f32 1.442695, %v2142_v13  ;;  %v832_v10 = vcvt.s32.f32 %v830_v15 }
 0x117   : > { %1324 = vpow2.f32 %v368_v8  ;;  %2591 = vst [vmem:[#allocation22_spill] sm:$0xff] %v2127_v54 }
 0x118   : > { %1326 = vpow2.f32 %v360_v0  ;;  %2592 = vst [vmem:[#allocation23_spill] sm:$0xff] %v2142_v13 }
 0x119   : > { %1328 = vpow2.f32 %v364_v20  ;;  %v372_v20 = vmul.f32 1.442695, %v2127_v54 }
 0x11a   : > { %388 = vadd.xlane.f32.xlu0 %v2066_v17  ;;  %1330 = vpow2.f32 %v374_v11 }
 0x11b   : > { %380 = vadd.xlane.f32.xlu2 %v2068_v6  ;;  %378 = vadd.xlane.f32.xlu1 %v2063_v2  ;;  %v2092_v9 = vpop.eup %1320  ;;  %1332 = vpow2.f32 %v366_v60 }
 0x11c   : > { %v2111_v55 = vpop.eup %1322  ;;  %1334 = vpow2.f32 %v370_v24  ;;  %v858_v24 = vand.u32 65535, %v1859_v21  ;;  %v844_v21 = vand.u32 65535, %v1895_v32  ;;  %v886_v32 = vand.u32 65535, %v1901_v36 }
 0x11d   : > { %v2114_v8 = vpop.eup %1324  ;;  %1336 = vpow2.f32 %v372_v20 }
 0x11e   : > { %v2116_v12 = vpop.eup %1326  ;;  %1338 = vpow2.f32 %v376_v14  ;;  %v860_v20 = vcvt.s32.f32 %v858_v24 }
 0x11f   : > { %v2130_v0 = vpop.eup %1328 }
 0x120   : > { %v2133_v11 = vpop.eup %1330 }
 0x121   : > { %v2135_v7 = vpop.eup %1332 }
 0x122   : > { %394 = vadd.xlane.f32.xlu0 %v2090_v18  ;;  %v2145_v34 = vpop.eup %1334 }
 0x123   : > { %386 = vadd.xlane.f32.xlu2 %v2087_v43  ;;  %384 = vadd.xlane.f32.xlu1 %v2092_v9  ;;  %2593 = vst [vmem:[#allocation24_spill] sm:$0xff] %v2145_v34  ;;  %v2147_v35 = vpop.eup %1336 }
 0x124   : > { %v2151_v60 = vpop.eup %1338 }
 0x125   : > { %2594 = vst [vmem:[#allocation25_spill] sm:$0xff] %v2151_v60 }
 0x12a   : > { %400 = vadd.xlane.f32.xlu0 %v2114_v8 }
 0x12b   : > { %392 = vadd.xlane.f32.xlu2 %v2116_v12  ;;  %390 = vadd.xlane.f32.xlu1 %v2111_v55 }
 0x132   : > { %406 = vadd.xlane.f32.xlu0 %v2133_v11 }
 0x133   : > { %398 = vadd.xlane.f32.xlu2 %v2135_v7  ;;  %396 = vadd.xlane.f32.xlu1 %v2130_v0 }
 0x13b   : > { %404 = vadd.xlane.f32.xlu2 %v2147_v35  ;;  %402 = vadd.xlane.f32.xlu1 %v2145_v34 }
 0x143   : > { %408 = vadd.xlane.f32.xlu1 %v2151_v60  ;;  %v900_v60 = vand.u32 65535, %v1887_v30 }
 0x145   : > { %v902_v34 = vcvt.s32.f32 %v900_v60 }
 0x15d   : > { %v2156_v23 = vpop.xlane.xlu0 %862 }
 0x15e   : > { %2595 = vst [vmem:[#allocation26_spill] sm:$0xff] %v2156_v23  ;;  %v2158_v13 = vpop.xlane.xlu1 %834  ;;  %vm864_vm0 = vcmp.eq.f32.partialorder %v1868_v25, %v2156_v23  ;;  %v846_v25 = vcvt.s32.f32 %v844_v21  ;;  %v874_v23 = vcvt.s32.f32 %v872_v22  ;;  %v984_v21 = vand.u32 65535, %v1955_v56 }
 0x15f   : > { %vm836_vm1 = vcmp.eq.f32.partialorder %v1870_v26, %v2158_v13  ;;  %v865_v14 = vsel %vm864_vm0, %v860_v20, inf  ;;  %v888_v20 = vcvt.s32.f32 %v886_v32  ;;  %v998_v32 = vand.u32 65535, %v1999_v1 }
 0x160   : > { %v837_v54 = vsel %vm836_vm1, %v832_v10, inf  ;;  %866 = vmin.xlane.f32.xlu1 %v865_v14  ;;  %v914_v10 = vand.u32 65535, %v1929_v45  ;;  %vm738_vm0 = vcmask 130112   ;;  %vm742_vm1 = vcmask 195712  }
 0x161   : > { %838 = vmin.xlane.f32.xlu2 %v837_v54  ;;  %v942_v54 = vand.u32 65535, %v1922_v44 }
 0x163   : > { %v944_v14 = vcvt.s32.f32 %v942_v54 }
 0x165   : > { %v2167_v24 = vpop.xlane.xlu0 %904 }
 0x166   : > { %v2169_v52 = vpop.xlane.xlu1 %876  ;;  %v2171_v15 = vpop.xlane.xlu2 %848  ;;  %vm906_vm2 = vcmp.eq.f32.partialorder %v1903_v37, %v2167_v24 }
 0x167   : > { %vm850_vm3 = vcmp.eq.f32.partialorder %v1907_v39, %v2171_v15  ;;  %vm878_vm4 = vcmp.eq.f32.partialorder %v1905_v38, %v2169_v52  ;;  %v907_v31 = vsel %vm906_vm2, %v902_v34, inf  ;;  %v916_v38 = vcvt.s32.f32 %v914_v10 }
 0x168   : > { %v851_v26 = vsel %vm850_vm3, %v846_v25, inf  ;;  %v879_v30 = vsel %vm878_vm4, %v874_v23, inf  ;;  %908 = vmin.xlane.f32.xlu1 %v907_v31  ;;  %v928_v34 = vand.u32 65535, %v1938_v50  ;;  %v956_v23 = vand.u32 65535, %v1962_v57 }
 0x169   : > { %852 = vmin.xlane.f32.xlu0 %v851_v26  ;;  %880 = vmin.xlane.f32.xlu2 %v879_v30  ;;  %v986_v26 = vcvt.s32.f32 %v984_v21  ;;  %v2596_v30 = vld [vmem:[#allocation15_spill] sm:$0xff]  ;;  %v1026_v10 = vand.u32 65535, %v1992_v41  ;;  %vm746_vm2 = vcmask 261312   ;;  %vm750_vm3 = vcmask 326912  }
 0x16a   : > { %v930_v25 = vcvt.s32.f32 %v928_v34  ;;  %v970_v31 = vand.u32 65535, %v2596_v30  ;;  %v1040_v34 = vand.u32 65535, %v2035_v3  ;;  %vm754_vm4 = vcmask 392512  }
 0x16d   : > { %v2182_v60 = vpop.xlane.xlu0 %946 }
 0x16e   : > { %v2184_v37 = vpop.xlane.xlu2 %890  ;;  %v2186_v39 = vpop.xlane.xlu1 %918  ;;  %vm948_vm5 = vcmp.eq.f32.partialorder %v1935_v49, %v2182_v60 }
 0x16f   : > { %vm892_vm6 = vcmp.eq.f32.partialorder %v1932_v47, %v2184_v37  ;;  %vm920_vm7 = vcmp.eq.f32.partialorder %v1940_v51, %v2186_v39  ;;  %v949_v45 = vsel %vm948_vm5, %v944_v14, inf  ;;  %v958_v51 = vcvt.s32.f32 %v956_v23  ;;  %v2597_v14 = vld [vmem:[#allocation18_spill] sm:$0xff] }
 0x170   : > { %v893_v36 = vsel %vm892_vm6, %v888_v20, inf  ;;  %v921_v44 = vsel %vm920_vm7, %v916_v38, inf  ;;  %950 = vmin.xlane.f32.xlu1 %v949_v45  ;;  %v972_v20 = vcvt.s32.f32 %v970_v31  ;;  %v1028_v38 = vcvt.s32.f32 %v1026_v10 }
 0x171   : > { %894 = vmin.xlane.f32.xlu0 %v893_v36  ;;  %922 = vmin.xlane.f32.xlu2 %v921_v44  ;;  %v2598_v44 = vld [vmem:[#allocation17_spill] sm:$0xff]  ;;  %vm758_vm5 = vcmask 458112   ;;  %vm762_vm6 = vcmask 523712   ;;  %vm766_vm7 = vcmask 589312  }
 0x172   : > { %v1012_v45 = vand.u32 65535, %v2598_v44 }
 0x175   : > { %v2197_v22 = vpop.xlane.xlu0 %988 }
 0x176   : > { %v2199_v49 = vpop.xlane.xlu2 %932  ;;  %v2201_v47 = vpop.xlane.xlu1 %960  ;;  %vm990_vm8 = vcmp.eq.f32.partialorder %v1968_v61, %v2197_v22 }
 0x177   : > { %vm934_vm9 = vcmp.eq.f32.partialorder %v1965_v59, %v2199_v49  ;;  %vm962_vm10 = vcmp.eq.f32.partialorder %v1973_v63, %v2201_v47  ;;  %v991_v57 = vsel %vm990_vm8, %v986_v26, inf  ;;  %v1000_v63 = vcvt.s32.f32 %v998_v32 }
 0x178   : > { %v935_v50 = vsel %vm934_vm9, %v930_v25, inf  ;;  %v963_v56 = vsel %vm962_vm10, %v958_v51, inf  ;;  %992 = vmin.xlane.f32.xlu1 %v991_v57  ;;  %v1014_v25 = vcvt.s32.f32 %v1012_v45  ;;  %v1042_v51 = vcvt.s32.f32 %v1040_v34 }
 0x179   : > { %936 = vmin.xlane.f32.xlu0 %v935_v50  ;;  %964 = vmin.xlane.f32.xlu2 %v963_v56  ;;  %vm770_vm8 = vcmask 654912   ;;  %vm774_vm9 = vcmask 720512   ;;  %vm778_vm10 = vcmask 786112  }
 0x17d   : > { %v2212_v54 = vpop.xlane.xlu0 %1030 }
 0x17e   : > { %v2214_v61 = vpop.xlane.xlu2 %974  ;;  %v2216_v59 = vpop.xlane.xlu1 %1002  ;;  %vm1032_vm11 = vcmp.eq.f32.partialorder %v2006_v58, %v2212_v54 }
 0x17f   : > { %vm976_vm12 = vcmp.eq.f32.partialorder %v2003_v48, %v2214_v61  ;;  %vm1004_vm13 = vcmp.eq.f32.partialorder %v2597_v14, %v2216_v59  ;;  %v1033_v36 = vsel %vm1032_vm11, %v1028_v38, inf  ;;  %vm2576_vm11 = vcmask 851712  }
 0x180   : > { %v977_v1 = vsel %vm976_vm12, %v972_v20, inf  ;;  %v1005_v41 = vsel %vm1004_vm13, %v1000_v63, inf  ;;  %1034 = vmin.xlane.f32.xlu1 %v1033_v36  ;;  %v2599_v20 = vld [vmem:[#allocation16_spill] sm:$0xff]  ;;  %vm2575_vm12 = vcmask 917312   ;;  %vm2574_vm13 = vcmask 982912  }
 0x181   : > { %978 = vmin.xlane.f32.xlu0 %v977_v1  ;;  %1006 = vmin.xlane.f32.xlu2 %v1005_v41 }
 0x185   : > { %v383_v23 = vpop.xlane.xlu0 %382 }
 0x186   : > { %v2226_v21 = vpop.xlane.xlu2 %1016  ;;  %v2228_v58 = vpop.xlane.xlu1 %1044  ;;  %1340 = vlog2.f32 %v383_v23  ;;  %v476_v48 = vsub.f32 %v383_v23, %v2042_v5 }
 0x187   : > { %vm1018_vm14 = vcmp.eq.f32.partialorder %v2038_v27, %v2226_v21  ;;  %vm1046_vm15 = vcmp.eq.f32.partialorder %v2044_v29, %v2228_v58 }
 0x188   : > { %1342 = vlog2.f32 %v476_v48  ;;  %v1019_v26 = vsel %vm1018_vm14, %v1014_v25, inf  ;;  %v2235_v50 = vsel %vm1046_vm15, %v1042_v51, inf  ;;  %v284_v51 = vld [vmem:[%s1777_s4 + $0x10] sm:$0xff] }
 0x189   : > { %1020 = vmin.xlane.f32.xlu0 %v1019_v26 }
 0x18c   : > { %v1341_v3 = vpop.eup %1340 }
 0x18d   : > { %v415_v56 = vmul.f32 0.6931472, %v1341_v3  ;;  %v389_v57 = vpop.xlane.xlu0 %388 }
 0x18e   : > { %v1343_v30 = vpop.eup %1342  ;;  %v381_v31 = vpop.xlane.xlu2 %380  ;;  %1344 = vlog2.f32 %v389_v57  ;;  %v479_v27 = vsub.f32 %v389_v57, %v2066_v17 }
 0x18f   : > { %v379_v32 = vpop.xlane.xlu1 %378  ;;  %v495_v5 = vmul.f32 0.6931472, %v1343_v30  ;;  %1346 = vlog2.f32 %v381_v31  ;;  %v475_v10 = vsub.f32 %v381_v31, %v2068_v6  ;;  %v444_v29 = vsub.f32 %v2599_v20, %v415_v56 }
 0x190   : > { %1348 = vlog2.f32 %v379_v32  ;;  %v474_v63 = vsub.f32 %v379_v32, %v2063_v2 }
 0x191   : > { %1350 = vlog2.f32 %v475_v10  ;;  %v524_v38 = vsub.f32 %v495_v5, %v415_v56  ;;  %v460_v41 = vmax.f32 %v444_v29, -100.0 }
 0x192   : > { %1352 = vlog2.f32 %v474_v63 }
 0x193   : > { %1354 = vlog2.f32 %v479_v27  ;;  %v540_v14 = vmax.f32 %v524_v38, -100.0 }
 0x194   : > { %v1345_v1 = vpop.eup %1344 }
 0x195   : > { %v1347_v36 = vpop.eup %1346  ;;  %v395_v44 = vpop.xlane.xlu0 %394  ;;  %v556_v17 = vsub.f32 %v460_v41, %v540_v14  ;;  %v421_v56 = vmul.f32 0.6931472, %v1345_v1 }
 0x196   : > { %v1349_v45 = vpop.eup %1348  ;;  %v413_v34 = vmul.f32 0.6931472, %v1347_v36  ;;  %v387_v6 = vpop.xlane.xlu2 %386  ;;  %1356 = vlog2.f32 %v395_v44  ;;  %v482_v25 = vsub.f32 %v395_v44, %v2090_v18 }
 0x197   : > { %v385_v23 = vpop.xlane.xlu1 %384  ;;  %v1351_v48 = vpop.eup %1350  ;;  %1358 = vlog2.f32 %v387_v6  ;;  %v478_v2 = vsub.f32 %v387_v6, %v2087_v43  ;;  %v411_v32 = vmul.f32 0.6931472, %v1349_v45  ;;  %v572_v27 = vmul.f32 %v556_v17, %v284_v51 }
 0x198   : > { %v1353_v26 = vpop.eup %1352  ;;  %v493_v3 = vmul.f32 0.6931472, %v1351_v48  ;;  %1360 = vlog2.f32 %v385_v23  ;;  %v477_v57 = vsub.f32 %v385_v23, %v2092_v9  ;;  %v443_v31 = vsub.f32 %v2027_v53, %v413_v34 }
 0x199   : > { %v1355_v30 = vpop.eup %1354  ;;  %v491_v5 = vmul.f32 0.6931472, %v1353_v26  ;;  %1362 = vlog2.f32 %v478_v2  ;;  %v447_v29 = vsub.f32 %v2020_v33, %v421_v56  ;;  %v588_v63 = vadd.f32 %v572_v27, %v540_v14 }
 0x19a   : > { %v501_v10 = vmul.f32 0.6931472, %v1355_v30  ;;  %1364 = vlog2.f32 %v477_v57  ;;  %v523_v43 = vsub.f32 %v493_v3, %v413_v34  ;;  %v459_v1 = vmax.f32 %v443_v31, -100.0  ;;  %v283_v31 = vld [vmem:[%s1777_s4 + $0x8] sm:$0xff] }
 0x19b   : > { %1366 = vlog2.f32 %v482_v25  ;;  %v522_v20 = vsub.f32 %v491_v5, %v411_v32  ;;  %v442_v9 = vsub.f32 %v2015_v62, %v411_v32  ;;  %v604_v23 = vsub.f32 0.0, %v588_v63  ;;  %v282_v32 = vld [vmem:[%s1777_s4] sm:$0xff] }
 0x19c   : > { %v1357_v18 = vpop.eup %1356  ;;  %v527_v36 = vsub.f32 %v501_v10, %v421_v56  ;;  %v539_v17 = vmax.f32 %v523_v43, -100.0  ;;  %v463_v5 = vmax.f32 %v447_v29, -100.0 }
 0x19d   : > { %v1359_v38 = vpop.eup %1358  ;;  %v2248_v41 = vmul.f32 0.6931472, %v1357_v18  ;;  %v401_v53 = vpop.xlane.xlu0 %400  ;;  %v538_v34 = vmax.f32 %v522_v20, -100.0  ;;  %673 = vadd.xlane.f32.xlu1 %v604_v23  ;;  %v458_v56 = vmax.f32 %v442_v9, -100.0 }
 0x19e   : > { %v1361_v44 = vpop.eup %1360  ;;  %v393_v45 = vpop.xlane.xlu2 %392  ;;  %1368 = vlog2.f32 %v401_v53  ;;  %v2250_v2 = vmul.f32 0.6931472, %v1359_v38  ;;  %v485_v62 = vsub.f32 %v401_v53, %v2114_v8  ;;  %v555_v8 = vsub.f32 %v459_v1, %v539_v17 }
 0x19f   : > { %v391_v6 = vpop.xlane.xlu1 %390  ;;  %v1363_v48 = vpop.eup %1362  ;;  %1370 = vlog2.f32 %v393_v45  ;;  %v481_v33 = vsub.f32 %v393_v45, %v2116_v12  ;;  %v2254_v25 = vmul.f32 0.6931472, %v1361_v44  ;;  %v450_v51 = vsub.f32 %v2053_v19, %v2248_v41 }
 0x1a0   : > { %v1365_v14 = vpop.eup %1364  ;;  %1372 = vlog2.f32 %v391_v6  ;;  %v480_v26 = vsub.f32 %v391_v6, %v2111_v55  ;;  %v499_v57 = vmul.f32 0.6931472, %v1363_v48  ;;  %v446_v10 = vsub.f32 %v2048_v16, %v2250_v2 }
 0x1a1   : > { %v1367_v3 = vpop.eup %1366  ;;  %v497_v30 = vmul.f32 0.6931472, %v1365_v14  ;;  %1374 = vlog2.f32 %v481_v33  ;;  %v554_v27 = vsub.f32 %v458_v56, %v538_v34  ;;  %v543_v19 = vmax.f32 %v527_v36, -100.0 }
 0x1a2   : > { %v507_v12 = vmul.f32 0.6931472, %v1367_v3  ;;  %1376 = vlog2.f32 %v480_v26  ;;  %v445_v55 = vsub.f32 %v2059_v46, %v2254_v25  ;;  %v2265_v20 = vmax.f32 %v450_v51, -100.0  ;;  %v287_v26 = vld [vmem:[%s1777_s4 + $0x28] sm:$0xff] }
 0x1a3   : > { %1378 = vlog2.f32 %v485_v62  ;;  %v571_v18 = vmul.f32 %v555_v8, %v283_v31  ;;  %v570_v9 = vmul.f32 %v554_v27, %v282_v32  ;;  %v526_v29 = vsub.f32 %v499_v57, %v2250_v2 }
 0x1a4   : > { %v1369_v43 = vpop.eup %1368  ;;  %v525_v53 = vsub.f32 %v497_v30, %v2254_v25  ;;  %v559_v6 = vsub.f32 %v463_v5, %v543_v19  ;;  %v530_v23 = vsub.f32 %v507_v12, %v2248_v41  ;;  %v462_v3 = vmax.f32 %v446_v10, -100.0 }
 0x1a5   : > { %v1371_v63 = vpop.eup %1370  ;;  %v2267_v38 = vmul.f32 0.6931472, %v1369_v43  ;;  %v407_v1 = vpop.xlane.xlu0 %406  ;;  %v587_v44 = vadd.f32 %v571_v18, %v539_v17  ;;  %v586_v51 = vadd.f32 %v570_v9, %v538_v34  ;;  %v461_v56 = vmax.f32 %v445_v55, -100.0  ;;  %v286_v43 = vld [vmem:[%s1777_s4 + $0x20] sm:$0xff]  ;;  %v285_v55 = vld [vmem:[%s1777_s4 + $0x18] sm:$0xff] }
 0x1a6   : > { %v1373_v16 = vpop.eup %1372  ;;  %v2271_v36 = vmul.f32 0.6931472, %v1371_v63  ;;  %v399_v45 = vpop.xlane.xlu2 %398  ;;  %v488_v17 = vsub.f32 %v407_v1, %v2133_v11  ;;  %v575_v12 = vmul.f32 %v559_v6, %v287_v26  ;;  %v541_v8 = vmax.f32 %v525_v53, -100.0 }
 0x1a7   : > { %v397_v46 = vpop.xlane.xlu1 %396  ;;  %v1375_v48 = vpop.eup %1374  ;;  %v2274_v33 = vmul.f32 0.6931472, %v1373_v16  ;;  %v453_v62 = vsub.f32 %v2077_v4, %v2267_v38  ;;  %1380 = vlog2.f32 %v399_v45  ;;  %v484_v2 = vsub.f32 %v399_v45, %v2135_v7 }
 0x1a8   : > { %v1377_v14 = vpop.eup %1376  ;;  %v603_v25 = vsub.f32 0.0, %v587_v44  ;;  %1382 = vlog2.f32 %v407_v1  ;;  %v449_v41 = vsub.f32 %v2083_v28, %v2271_v36  ;;  %v505_v30 = vmul.f32 0.6931472, %v1375_v48 }
 0x1a9   : > { %1384 = vlog2.f32 %v484_v2  ;;  %v1379_v57 = vpop.eup %1378  ;;  %v448_v4 = vsub.f32 %v2072_v40, %v2274_v33  ;;  %v602_v7 = vsub.f32 0.0, %v586_v51  ;;  %v503_v34 = vmul.f32 0.6931472, %v1377_v14  ;;  %v290_v2 = vld [vmem:[%s1777_s4 + $0x40] sm:$0xff] }
 0x1aa   : > { %671 = vadd.xlane.f32.xlu0 %v603_v25  ;;  %1386 = vlog2.f32 %v397_v46  ;;  %v2285_v31 = vmax.f32 %v453_v62, -100.0  ;;  %v483_v11 = vsub.f32 %v397_v46, %v2130_v0  ;;  %v542_v28 = vmax.f32 %v526_v29, -100.0  ;;  %v2600_v25 = vld [vmem:[#allocation24_spill] sm:$0xff] }
 0x1ab   : > { %669 = vadd.xlane.f32.xlu2 %v602_v7  ;;  %1388 = vlog2.f32 %v488_v17  ;;  %v546_v32 = vmax.f32 %v530_v23, -100.0  ;;  %v465_v10 = vmax.f32 %v449_v41, -100.0  ;;  %v2288_v27 = vmul.f32 0.6931472, %v1379_v57  ;;  %v2601_v41 = vld [vmem:[#allocation19_spill] sm:$0xff] }
 0x1ac   : > { %1390 = vlog2.f32 %v483_v11  ;;  %v591_v40 = vadd.f32 %v575_v12, %v543_v19  ;;  %v558_v0 = vsub.f32 %v462_v3, %v542_v28  ;;  %v557_v1 = vsub.f32 %v461_v56, %v541_v8  ;;  %v289_v12 = vld [vmem:[%s1777_s4 + $0x38] sm:$0xff] }
 0x1ad   : > { %v1381_v5 = vpop.eup %1380  ;;  %v529_v29 = vsub.f32 %v505_v30, %v2271_v36  ;;  %v562_v19 = vsub.f32 %v2265_v20, %v546_v32  ;;  %v464_v6 = vmax.f32 %v448_v4, -100.0  ;;  %v528_v51 = vsub.f32 %v503_v34, %v2274_v33 }
 0x1ae   : > { %v2292_v18 = vpop.eup %1382  ;;  %v2294_v63 = vmul.f32 0.6931472, %v1381_v5  ;;  %v405_v9 = vpop.xlane.xlu2 %404  ;;  %v607_v44 = vsub.f32 0.0, %v591_v40  ;;  %v574_v48 = vmul.f32 %v558_v0, %v286_v43  ;;  %v573_v62 = vmul.f32 %v557_v1, %v285_v55 }
 0x1af   : > { %v403_v16 = vpop.xlane.xlu1 %402  ;;  %v1385_v53 = vpop.eup %1384  ;;  %1392 = vlog2.f32 %v405_v9  ;;  %v487_v45 = vsub.f32 %v405_v9, %v2147_v35  ;;  %v545_v30 = vmax.f32 %v529_v29, -100.0  ;;  %v544_v43 = vmax.f32 %v528_v51, -100.0  ;;  %v292_v51 = vld [vmem:[%s1777_s4 + $0x50] sm:$0xff] }
 0x1b0   : > { %v1387_v46 = vpop.eup %1386  ;;  %v452_v23 = vsub.f32 %v2107_v42, %v2294_v63  ;;  %679 = vadd.xlane.f32.xlu1 %v607_v44  ;;  %v486_v36 = vsub.f32 %v403_v16, %v2600_v25  ;;  %v511_v17 = vmul.f32 0.6931472, %v1385_v53  ;;  %v590_v20 = vadd.f32 %v574_v48, %v542_v28 }
 0x1b1   : > { %v429_v14 = vmul.f32 0.6931472, %v1387_v46  ;;  %1394 = vlog2.f32 %v487_v45  ;;  %v1389_v26 = vpop.eup %1388  ;;  %v589_v3 = vadd.f32 %v573_v62, %v541_v8  ;;  %v578_v42 = vmul.f32 %v562_v19, %v290_v2  ;;  %v288_v8 = vld [vmem:[%s1777_s4 + $0x30] sm:$0xff]  ;;  %v2602_v45 = vld [vmem:[#allocation25_spill] sm:$0xff] }
 0x1b2   : > { %v468_v35 = vmax.f32 %v452_v23, -100.0  ;;  %v1391_v56 = vpop.eup %1390  ;;  %1396 = vlog2.f32 %v403_v16  ;;  %v606_v7 = vsub.f32 0.0, %v590_v20  ;;  %v2306_v40 = vmul.f32 0.6931472, %v1389_v26 }
 0x1b3   : > { %v451_v57 = vsub.f32 %v2601_v41, %v429_v14  ;;  %v509_v4 = vmul.f32 0.6931472, %v1391_v56  ;;  %v605_v11 = vsub.f32 0.0, %v589_v3  ;;  %1398 = vlog2.f32 %v486_v36  ;;  %v291_v56 = vld [vmem:[%s1777_s4 + $0x48] sm:$0xff]  ;;  %v2604_v41 = vld [vmem:[#allocation21_spill] sm:$0xff] }
 0x1b4   : > { %v594_v33 = vadd.f32 %v578_v42, %v546_v32  ;;  %v561_v34 = vsub.f32 %v465_v10, %v545_v30  ;;  %677 = vadd.xlane.f32.xlu0 %v606_v7  ;;  %v533_v0 = vsub.f32 %v2288_v27, %v2267_v38  ;;  %v532_v9 = vsub.f32 %v511_v17, %v2294_v63  ;;  %v293_v27 = vld [vmem:[%s1777_s4 + $0x58] sm:$0xff] }
 0x1b5   : > { %v1393_v5 = vpop.eup %1392  ;;  %675 = vadd.xlane.f32.xlu2 %v605_v11  ;;  %v531_v1 = vsub.f32 %v509_v4, %v429_v14  ;;  %v560_v44 = vsub.f32 %v464_v6, %v544_v43  ;;  %v467_v32 = vmax.f32 %v451_v57, -100.0  ;;  %v2603_v14 = vld [vmem:[#allocation22_spill] sm:$0xff]  ;;  %v439_v11 = vmul.f32 0.6931472, %v2292_v18 }
 0x1b6   : > { %v437_v28 = vmul.f32 0.6931472, %v1393_v5  ;;  %v610_v29 = vsub.f32 0.0, %v594_v33  ;;  %v577_v53 = vmul.f32 %v561_v34, %v289_v12  ;;  %v549_v46 = vmax.f32 %v533_v0, -100.0  ;;  %v294_v18 = vld [vmem:[%s1777_s4 + $0x60] sm:$0xff] }
 0x1b7   : > { %v409_v55 = vpop.xlane.xlu1 %408  ;;  %v1395_v16 = vpop.eup %1394  ;;  %v576_v38 = vmul.f32 %v560_v44, %v288_v8  ;;  %v548_v62 = vmax.f32 %v532_v9, -100.0  ;;  %v547_v63 = vmax.f32 %v531_v1, -100.0  ;;  %v2605_v44 = vld [vmem:[#allocation23_spill] sm:$0xff] }
 0x1b8   : > { %1400 = vlog2.f32 %v409_v55  ;;  %v517_v10 = vmul.f32 0.6931472, %v1395_v16  ;;  %v489_v19 = vsub.f32 %v409_v55, %v2602_v45  ;;  %v1397_v23 = vpop.eup %1396  ;;  %685 = vadd.xlane.f32.xlu1 %v610_v29  ;;  %v593_v48 = vadd.f32 %v577_v53, %v545_v30  ;;  %v295_v29 = vld [vmem:[%s1777_s4 + $0x68] sm:$0xff] }
 0x1b9   : > { %v1399_v2 = vpop.eup %1398  ;;  %v455_v25 = vsub.f32 %v2603_v14, %v437_v28  ;;  %v435_v36 = vmul.f32 0.6931472, %v1397_v23  ;;  %v565_v6 = vsub.f32 %v2285_v31, %v549_v46  ;;  %v592_v20 = vadd.f32 %v576_v38, %v544_v43 }
 0x1ba   : > { %1402 = vlog2.f32 %v489_v19  ;;  %v515_v26 = vmul.f32 0.6931472, %v1399_v2  ;;  %v609_v17 = vsub.f32 0.0, %v593_v48  ;;  %v564_v3 = vsub.f32 %v468_v35, %v548_v62 }
 0x1bb   : > { %v454_v57 = vsub.f32 %v2604_v41, %v435_v36  ;;  %v581_v42 = vmul.f32 %v565_v6, %v293_v27  ;;  %v563_v30 = vsub.f32 %v467_v32, %v547_v63  ;;  %v535_v4 = vsub.f32 %v517_v10, %v437_v28  ;;  %v297_v6 = vld [vmem:[%s1777_s4 + $0x78] sm:$0xff] }
 0x1bc   : > { %v608_v12 = vsub.f32 0.0, %v592_v20  ;;  %v580_v5 = vmul.f32 %v564_v3, %v292_v51  ;;  %v534_v33 = vsub.f32 %v515_v26, %v435_v36  ;;  %v471_v31 = vmax.f32 %v455_v25, -100.0  ;;  %683 = vadd.xlane.f32.xlu0 %v609_v17  ;;  %v296_v3 = vld [vmem:[%s1777_s4 + $0x70] sm:$0xff] }
 0x1bd   : > { %v597_v8 = vadd.f32 %v581_v42, %v549_v46  ;;  %v579_v43 = vmul.f32 %v563_v30, %v291_v56  ;;  %v470_v35 = vmax.f32 %v454_v57, -100.0  ;;  %v551_v0 = vmax.f32 %v535_v4, -100.0  ;;  %v2606_v46 = vld [vmem:[#allocation20_spill] sm:$0xff] }
 0x1be   : > { %v1401_v7 = vpop.eup %1400  ;;  %681 = vadd.xlane.f32.xlu2 %v608_v12  ;;  %v596_v55 = vadd.f32 %v580_v5, %v548_v62  ;;  %v550_v9 = vmax.f32 %v534_v33, -100.0  ;;  %v536_v53 = vsub.f32 %v2306_v40, %v439_v11  ;;  %v456_v23 = vsub.f32 %v2606_v46, %v439_v11 }
 0x1bf   : > { %v441_v34 = vmul.f32 0.6931472, %v1401_v7  ;;  %v613_v28 = vsub.f32 0.0, %v597_v8  ;;  %v595_v16 = vadd.f32 %v579_v43, %v547_v63  ;;  %v567_v45 = vsub.f32 %v471_v31, %v551_v0  ;;  %v2607_v8 = vld [vmem:[#allocation26_spill] sm:$0xff] }
 0x1c0   : > { %v1403_v1 = vpop.eup %1402  ;;  %v566_v19 = vsub.f32 %v470_v35, %v550_v9  ;;  %v612_v48 = vsub.f32 0.0, %v596_v55  ;;  %v552_v63 = vmax.f32 %v536_v53, -100.0  ;;  %v472_v36 = vmax.f32 %v456_v23, -100.0 }
 0x1c1   : > { %v457_v32 = vsub.f32 %v2605_v44, %v441_v34  ;;  %v521_v10 = vmul.f32 0.6931472, %v1403_v1  ;;  %691 = vadd.xlane.f32.xlu1 %v613_v28  ;;  %v611_v38 = vsub.f32 0.0, %v595_v16  ;;  %v583_v27 = vmul.f32 %v567_v45, %v295_v29  ;;  %v2608_v44 = vld [vmem:[#allocation14_spill] sm:$0xff] }
 0x1c2   : > { %v582_v62 = vmul.f32 %v566_v19, %v294_v18  ;;  %v568_v17 = vsub.f32 %v472_v36, %v552_v63  ;;  %v841_v7 = vcvt.f32.s32 %v2158_v13  ;;  %v869_v43 = vcvt.f32.s32 %v2607_v8 }
 0x1c3   : > { %v537_v2 = vsub.f32 %v521_v10, %v441_v34  ;;  %v473_v14 = vmax.f32 %v457_v32, -100.0  ;;  %v599_v40 = vadd.f32 %v583_v27, %v551_v0  ;;  %v883_v35 = vcvt.f32.s32 %v2169_v52 }
 0x1c4   : > { %689 = vadd.xlane.f32.xlu0 %v612_v48  ;;  %v598_v51 = vadd.f32 %v582_v62, %v550_v9  ;;  %v584_v42 = vmul.f32 %v568_v17, %v296_v3  ;;  %v842_v33 = vshll.u32 %v841_v7, 16  ;;  %v855_v55 = vcvt.f32.s32 %v2171_v15 }
 0x1c5   : > { %v553_v25 = vmax.f32 %v537_v2, -100.0  ;;  %v615_v56 = vsub.f32 0.0, %v599_v40  ;;  %v870_v9 = vshll.u32 %v869_v43, 16  ;;  %v884_v1 = vshll.u32 %v883_v35, 16 }
 0x1c6   : > { %687 = vadd.xlane.f32.xlu2 %v611_v38  ;;  %v614_v41 = vsub.f32 0.0, %v598_v51  ;;  %v600_v4 = vadd.f32 %v584_v42, %v552_v63  ;;  %v856_v16 = vshll.u32 %v855_v55, 16  ;;  %v2333_v32 = vadd.s32 4294967288, %v2608_v44 }
 0x1c7   : > { %v569_v26 = vsub.f32 %v473_v14, %v553_v25  ;;  %v2336_v10 = vadd.s32 4294967280, %v2608_v44  ;;  %v2339_v15 = vadd.s32 4294967272, %v2608_v44  ;;  %v911_v19 = vcvt.f32.s32 %v2167_v24 }
 0x1c8   : > { %v616_v12 = vsub.f32 0.0, %v600_v4  ;;  %v897_v46 = vcvt.f32.s32 %v2184_v37  ;;  %v925_v23 = vcvt.f32.s32 %v2186_v39  ;;  %v2352_v17 = vadd.s32 4294967264, %v2608_v44 }
 0x1c9   : > { %v585_v20 = vmul.f32 %v569_v26, %v297_v6  ;;  %v912_v14 = vshll.u32 %v911_v19, 16  ;;  %v2355_v3 = vadd.s32 4294967256, %v2608_v44  ;;  %v953_v42 = vcvt.f32.s32 %v2182_v60 }
 0x1ca   : > { %v898_v24 = vshll.u32 %v897_v46, 16  ;;  %v967_v4 = vcvt.f32.s32 %v2201_v47 }
 0x1cb   : > { %v601_v57 = vadd.f32 %v585_v20, %v553_v25  ;;  %v926_v25 = vshll.u32 %v925_v23, 16 }
 0x1cc   : > { %695 = vadd.xlane.f32.xlu0 %v615_v56  ;;  %v968_v8 = vshll.u32 %v967_v4, 16 }
 0x1cd   : > { %v617_v30 = vsub.f32 0.0, %v601_v57  ;;  %v2358_v57 = vadd.s32 4294967248, %v2608_v44 }
 0x1ce   : > { %693 = vadd.xlane.f32.xlu2 %v614_v41 }
 0x1cf   : > { %699 = vadd.xlane.f32.xlu1 %v617_v30  ;;  %v939_v30 = vcvt.f32.s32 %v2199_v49 }
 0x1d3   : > { %v867_v11 = vpop.xlane.xlu1 %866 }
 0x1d4   : > { %v839_v5 = vpop.xlane.xlu2 %838  ;;  %697 = vadd.xlane.f32.xlu0 %v616_v12  ;;  %v868_v0 = vcvt.f32.s32 %v867_v11 }
 0x1d5   : > { %v840_v31 = vcvt.f32.s32 %v839_v5 }
 0x1d6   : > { %1048 = vmin.xlane.f32.xlu2 %v2235_v50  ;;  %v871_v50 = vadd.s32 %v870_v9, %v868_v0  ;;  %v2370_v9 = vadd.s32 4294967240, %v2608_v44 }
 0x1d7   : > { %v843_v34 = vadd.s32 %v842_v33, %v840_v31  ;;  %v954_v31 = vshll.u32 %v953_v42, 16 }
 0x1d8   : > { %v1057_v62 = vperm.slane %v871_v50, %v2336_v10  ;;  %v1009_v50 = vcvt.f32.s32 %v2216_v59 }
 0x1d9   : > { %v1054_v48 = vperm.slane %v843_v34, %v2608_v44  ;;  %v940_v34 = vshll.u32 %v939_v30, 16 }
 0x1db   : > { %v909_v18 = vpop.xlane.xlu1 %908 }
 0x1dc   : > { %v881_v28 = vpop.xlane.xlu2 %880  ;;  %v853_v13 = vpop.xlane.xlu0 %852  ;;  %v910_v27 = vcvt.f32.s32 %v909_v18  ;;  %v995_v18 = vcvt.f32.s32 %v2197_v22 }
 0x1dd   : > { %v882_v29 = vcvt.f32.s32 %v881_v28  ;;  %v854_v53 = vcvt.f32.s32 %v853_v13  ;;  %v2373_v28 = vadd.s32 4294967232, %v2608_v44 }
 0x1de   : > { %v913_v20 = vadd.s32 %v912_v14, %v910_v27  ;;  %v1010_v27 = vshll.u32 %v1009_v50, 16  ;;  %v2388_v14 = vadd.s32 4294967216, %v2608_v44 }
 0x1df   : > { %v885_v45 = vadd.s32 %v884_v1, %v882_v29  ;;  %v857_v52 = vadd.s32 %v856_v16, %v854_v53  ;;  %v2376_v29 = vadd.s32 4294967224, %v2608_v44  ;;  %v981_v53 = vcvt.f32.s32 %v2214_v61 }
 0x1e0   : > { %v1063_v12 = vperm.slane %v913_v20, %v2355_v3 }
 0x1e1   : > { %v1055_v38 = vperm.slane %v857_v52, %v2333_v32  ;;  %v1059_v63 = vperm.slane %v885_v45, %v2339_v15 }
 0x1e3   : > { %v1056_v2 = vsel %vm738_vm0, %v1055_v38, %v1054_v48  ;;  %v951_v6 = vpop.xlane.xlu1 %950  ;;  %v996_v48 = vshll.u32 %v995_v18, 16  ;;  %v982_v38 = vshll.u32 %v981_v53, 16 }
 0x1e4   : > { %v923_v37 = vpop.xlane.xlu2 %922  ;;  %v895_v36 = vpop.xlane.xlu0 %894  ;;  %v1058_v39 = vsel %vm742_vm1, %v1057_v62, %v1056_v2  ;;  %v952_v11 = vcvt.f32.s32 %v951_v6  ;;  %v1037_v6 = vcvt.f32.s32 %v2212_v54 }
 0x1e5   : > { %v924_v40 = vcvt.f32.s32 %v923_v37  ;;  %v896_v51 = vcvt.f32.s32 %v895_v36  ;;  %v1060_v26 = vsel %vm746_vm2, %v1059_v63, %v1058_v39 }
 0x1e6   : > { %v955_v1 = vadd.s32 %v954_v31, %v952_v11  ;;  %v1038_v30 = vshll.u32 %v1037_v6, 16 }
 0x1e7   : > { %v927_v56 = vadd.s32 %v926_v25, %v924_v40  ;;  %v899_v41 = vadd.s32 %v898_v24, %v896_v51  ;;  %v2391_v25 = vadd.s32 4294967208, %v2608_v44  ;;  %v2394_v40 = vadd.s32 4294967200, %v2608_v44 }
 0x1e8   : > { %v1069_v19 = vperm.slane %v955_v1, %v2373_v28  ;;  %v1023_v51 = vcvt.f32.s32 %v2226_v21 }
 0x1e9   : > { %v1061_v7 = vperm.slane %v899_v41, %v2352_v17  ;;  %v1065_v33 = vperm.slane %v927_v56, %v2358_v57 }
 0x1ea   : > { %v1024_v54 = vshll.u32 %v1023_v51, 16 }
 0x1eb   : > { %v1062_v5 = vsel %vm750_vm3, %v1061_v7, %v1060_v26  ;;  %v993_v35 = vpop.xlane.xlu1 %992 }
 0x1ec   : > { %v965_v60 = vpop.xlane.xlu2 %964  ;;  %v937_v43 = vpop.xlane.xlu0 %936  ;;  %v1064_v49 = vsel %vm754_vm4, %v1063_v12, %v1062_v5  ;;  %v994_v52 = vcvt.f32.s32 %v993_v35  ;;  %v2405_v12 = vadd.s32 4294967192, %v2608_v44 }
 0x1ed   : > { %v966_v47 = vcvt.f32.s32 %v965_v60  ;;  %v938_v55 = vcvt.f32.s32 %v937_v43  ;;  %v1066_v0 = vsel %vm758_vm5, %v1065_v33, %v1064_v49  ;;  %v2408_v33 = vadd.s32 4294967184, %v2608_v44 }
 0x1ee   : > { %v997_v24 = vadd.s32 %v996_v48, %v994_v52  ;;  %v2609_v49 = vlaneseq }
 0x1ef   : > { %v969_v13 = vadd.s32 %v968_v8, %v966_v47  ;;  %v941_v16 = vadd.s32 %v940_v34, %v938_v55 }
 0x1f0   : > { %v1075_v56 = vperm.slane %v997_v24, %v2391_v25  ;;  %v2417_v47 = vshrl.u32 %v2609_v49, 7 }
 0x1f1   : > { %v1067_v45 = vperm.slane %v941_v16, %v2370_v9  ;;  %v1071_v23 = vperm.slane %v969_v13, %v2376_v29  ;;  %v2421_v13 = vstv %s1253_s23  ;;  %s1502_s23 = scalar_lea.hbm %s2557_s2, 3 }
 0x1f2   : > { %v621_v55 = vadd.s32 8, %v2417_v47  ;;  %v637_v16 = vadd.s32 %v2421_v13, %v2417_v47  ;;  %v623_v53 = vadd.s32 24, %v2417_v47  ;;  %v622_v50 = vadd.s32 16, %v2417_v47  ;;  %p1504_p11 = scmp.lt.s32.totalorder %s1502_s23, %s1498_s22 }
 0x1f3   : > { %v1068_v46 = vsel %vm762_vm6, %v1067_v45, %v1066_v0  ;;  %v1035_v36 = vpop.xlane.xlu1 %1034  ;;  %v624_v45 = vadd.s32 32, %v2417_v47 }
 0x1f4   : > { %v1007_v22 = vpop.xlane.xlu2 %1006  ;;  %v979_v62 = vpop.xlane.xlu0 %978  ;;  %v1070_v61 = vsel %vm766_vm7, %v1069_v19, %v1068_v46  ;;  %v1036_v20 = vcvt.f32.s32 %v1035_v36  ;;  %v638_v18 = vadd.s32 %v2421_v13, %v621_v55  ;;  %vm653_vm14 = vcmp.lt.s32.totalorder %v637_v16, 300  ;;  %p1505_p12 = por %p1504_p11, %p1503_p8 }
 0x1f5   : > { %v1008_v59 = vcvt.f32.s32 %v1007_v22  ;;  %v980_v2 = vcvt.f32.s32 %v979_v62  ;;  %v1072_v63 = vsel %vm770_vm8, %v1071_v23, %v1070_v61  ;;  %v640_v52 = vadd.s32 %v2421_v13, %v623_v53 }
 0x1f6   : > { %v1039_v5 = vadd.s32 %v1038_v30, %v1036_v20  ;;  %vm654_vm15 = vcmp.lt.s32.totalorder %v638_v18, 300  ;;  %v639_v19 = vadd.s32 %v2421_v13, %v622_v50  ;;  %v626_v62 = vadd.s32 48, %v2417_v47  ;;  %p1506_p0 = pnand %p1505_p12, %p1501_p7 }
 0x1f7   : > { %v1011_v37 = vadd.s32 %v1010_v27, %v1008_v59  ;;  %v983_v39 = vadd.s32 %v982_v38, %v980_v2  ;;  %v641_v27 = vadd.s32 %v2421_v13, %v624_v45  ;;  %v625_v61 = vadd.s32 40, %v2417_v47 }
 0x1f8   : > { %v1081_v8 = vperm.slane %v1039_v5, %v2408_v33  ;;  %v627_v59 = vadd.s32 56, %v2417_v47  ;;  %v632_v55 = vadd.s32 96, %v2417_v47  ;;  %v633_v53 = vadd.s32 104, %v2417_v47 }
 0x1f9   : > { %v1073_v26 = vperm.slane %v983_v39, %v2388_v14  ;;  %v1077_v42 = vperm.slane %v1011_v37, %v2394_v40  ;;  %v643_v37 = vadd.s32 %v2421_v13, %v626_v62  ;;  %v642_v39 = vadd.s32 %v2421_v13, %v625_v61 }
 0x1fa   : > { %v644_v6 = vadd.s32 %v2421_v13, %v627_v59 }
 0x1fb   : > { %v1074_v41 = vsel %vm774_vm9, %v1073_v26, %v1072_v63 }
 0x1fc   : > { %v1021_v4 = vpop.xlane.xlu0 %1020  ;;  %v1076_v7 = vsel %vm778_vm10, %v1075_v56, %v1074_v41  ;;  %v629_v56 = vadd.s32 72, %v2417_v47 }
 0x1fd   : > { %v1022_v11 = vcvt.f32.s32 %v1021_v4  ;;  %v1078_v21 = vsel %vm2576_vm11, %v1077_v42, %v1076_v7  ;;  %vm657_vm11 = vcmp.lt.s32.totalorder %v641_v27, 300 }
 0x1fe   : > { %v646_v5 = vadd.s32 %v2421_v13, %v629_v56 }
 0x1ff   : > { %v1025_v31 = vadd.s32 %v1024_v54, %v1022_v11  ;;  %v630_v11 = vadd.s32 80, %v2417_v47 }
 0x201   : > { %v1079_v34 = vperm.slane %v1025_v31, %v2405_v12  ;;  %v647_v49 = vadd.s32 %v2421_v13, %v630_v11 }
 0x203   : > { %v1080_v60 = vsel %vm2575_vm12, %v1079_v34, %v1078_v21  ;;  %vm655_vm12 = vcmp.lt.s32.totalorder %v639_v19, 300  ;;  %v649_v19 = vadd.s32 %v2421_v13, %v632_v55 }
 0x204   : > { %v2414_v43 = vsel %vm2574_vm13, %v1081_v8, %v1080_v60  ;;  %vm656_vm13 = vcmp.lt.s32.totalorder %v640_v52, 300 }
 0x210   : > { %v674_v35 = vpop.xlane.xlu1 %673 }
 0x211   : > { %v703_v36 = vsel %vm655_vm12, %v674_v35, 0.0  ;;  %v631_v35 = vadd.s32 88, %v2417_v47  ;;  %vm2612_vm12 = vcmask 982912  }
 0x212   : > { %v741_v41 = vperm.slane %v703_v36, %v2336_v10 }
 0x21d   : > { %v672_v1 = vpop.xlane.xlu0 %671 }
 0x21e   : > { %v670_v0 = vpop.xlane.xlu2 %669  ;;  %v702_v48 = vsel %vm654_vm15, %v672_v1, 0.0 }
 0x21f   : > { %v701_v23 = vsel %vm653_vm14, %v670_v0, 0.0  ;;  %v737_v63 = vperm.slane %v702_v48, %v2333_v32  ;;  %v628_v32 = vadd.s32 64, %v2417_v47  ;;  %vm658_vm14 = vcmp.lt.s32.totalorder %v642_v39, 300 }
 0x220   : > { %v735_v2 = vperm.slane %v701_v23, %v2608_v44 }
 0x221   : > { %v645_v31 = vadd.s32 %v2421_v13, %v628_v32 }
 0x222   : > { %v739_v51 = vsel %vm738_vm0, %v737_v63, %v735_v2  ;;  %vm660_vm0 = vcmp.lt.s32.totalorder %v644_v6, 300 }
 0x223   : > { %v680_v46 = vpop.xlane.xlu1 %679  ;;  %v743_v7 = vsel %vm742_vm1, %v741_v41, %v739_v51  ;;  %vm662_vm1 = vcmp.lt.s32.totalorder %v646_v5, 300  ;;  %v792_v51 = vadd.s32 4294967176, %v2608_v44 }
 0x224   : > { %v706_v10 = vsel %vm658_vm14, %v680_v46, 0.0  ;;  %v635_v46 = vadd.s32 120, %v2417_v47 }
 0x226   : > { %v652_v62 = vadd.s32 %v2421_v13, %v635_v46 }
 0x227   : > { %v678_v22 = vpop.xlane.xlu0 %677 }
 0x228   : > { %v676_v38 = vpop.xlane.xlu2 %675  ;;  %v705_v20 = vsel %vm657_vm11, %v678_v22, 0.0  ;;  %v634_v22 = vadd.s32 112, %v2417_v47  ;;  %vm668_vm11 = vcmp.lt.s32.totalorder %v652_v62, 300 }
 0x229   : > { %v704_v24 = vsel %vm656_vm13, %v676_v38, 0.0  ;;  %vm659_vm13 = vcmp.lt.s32.totalorder %v643_v37, 300  ;;  %v749_v54 = vperm.slane %v705_v20, %v2352_v17  ;;  %v753_v17 = vperm.slane %v706_v10, %v2355_v3 }
 0x22a   : > { %v745_v26 = vperm.slane %v704_v24, %v2339_v15  ;;  %v648_v3 = vadd.s32 %v2421_v13, %v631_v35  ;;  %v650_v38 = vadd.s32 %v2421_v13, %v633_v53 }
 0x22b   : > { %v686_v30 = vpop.xlane.xlu1 %685 }
 0x22c   : > { %v747_v15 = vsel %vm746_vm2, %v745_v26, %v743_v7  ;;  %vm661_vm2 = vcmp.lt.s32.totalorder %v645_v31, 300  ;;  %v1051_v26 = vcvt.f32.s32 %v2228_v58 }
 0x22d   : > { %v751_v34 = vsel %vm750_vm3, %v749_v54, %v747_v15  ;;  %vm663_vm3 = vcmp.lt.s32.totalorder %v647_v49, 300  ;;  %v709_v45 = vsel %vm661_vm2, %v686_v30, 0.0 }
 0x22e   : > { %v755_v1 = vsel %vm754_vm4, %v753_v17, %v751_v34  ;;  %v765_v27 = vperm.slane %v709_v45, %v2373_v28  ;;  %vm664_vm4 = vcmp.lt.s32.totalorder %v648_v3, 300  ;;  %v651_v28 = vadd.s32 %v2421_v13, %v634_v22 }
 0x22f   : > { %v684_v42 = vpop.xlane.xlu0 %683  ;;  %v1052_v32 = vshll.u32 %v1051_v26, 16 }
 0x230   : > { %v708_v60 = vsel %vm660_vm0, %v684_v42, 0.0 }
 0x231   : > { %v682_v4 = vpop.xlane.xlu2 %681  ;;  %v761_v16 = vperm.slane %v708_v60, %v2370_v9 }
 0x232   : > { %v707_v21 = vsel %vm659_vm13, %v682_v4, 0.0 }
 0x233   : > { %v757_v8 = vperm.slane %v707_v21, %v2358_v57 }
 0x234   : > { %v692_v52 = vpop.xlane.xlu1 %691 }
 0x235   : > { %v759_v57 = vsel %vm758_vm5, %v757_v8, %v755_v1  ;;  %vm665_vm5 = vcmp.lt.s32.totalorder %v649_v19, 300  ;;  %v712_v24 = vsel %vm664_vm4, %v692_v52, 0.0 }
 0x236   : > { %v763_v23 = vsel %vm762_vm6, %v761_v16, %v759_v57  ;;  %vm666_vm6 = vcmp.lt.s32.totalorder %v650_v38, 300 }
 0x237   : > { %v690_v0 = vpop.xlane.xlu0 %689  ;;  %v767_v61 = vsel %vm766_vm7, %v765_v27, %v763_v23  ;;  %vm667_vm7 = vcmp.lt.s32.totalorder %v651_v28, 300 }
 0x238   : > { %v711_v9 = vsel %vm663_vm3, %v690_v0, 0.0 }
 0x239   : > { %v688_v18 = vpop.xlane.xlu2 %687  ;;  %v773_v59 = vperm.slane %v711_v9, %v2388_v14  ;;  %v777_v14 = vperm.slane %v712_v24, %v2391_v25 }
 0x23a   : > { %v710_v50 = vsel %vm662_vm1, %v688_v18, 0.0 }
 0x23b   : > { %v769_v48 = vperm.slane %v710_v50, %v2376_v29 }
 0x23d   : > { %v771_v63 = vsel %vm770_vm8, %v769_v48, %v767_v61  ;;  %vm2610_vm8 = vcmask 851712  }
 0x23e   : > { %v775_v36 = vsel %vm774_vm9, %v773_v59, %v771_v63  ;;  %vm794_vm9 = vcmask 1048512  }
 0x23f   : > { %v696_v2 = vpop.xlane.xlu0 %695  ;;  %v779_v13 = vsel %vm778_vm10, %v777_v14, %v775_v36  ;;  %vm2611_vm10 = vcmask 917312  }
 0x240   : > { %v714_v6 = vsel %vm666_vm6, %v696_v2, 0.0 }
 0x241   : > { %v694_v29 = vpop.xlane.xlu2 %693  ;;  %v785_v56 = vperm.slane %v714_v6, %v2405_v12 }
 0x242   : > { %v713_v37 = vsel %vm665_vm5, %v694_v29, 0.0  ;;  %v700_v47 = vpop.xlane.xlu1 %699 }
 0x243   : > { %v781_v39 = vperm.slane %v713_v37, %v2394_v40  ;;  %v716_v20 = vsel %vm668_vm11, %v700_v47, 0.0 }
 0x244   : > { %v793_v58 = vperm.slane %v716_v20, %v792_v51 }
 0x245   : > { %v783_v40 = vsel %vm2610_vm8, %v781_v39, %v779_v13 }
 0x246   : > { %v787_v30 = vsel %vm2611_vm10, %v785_v56, %v783_v40 }
 0x247   : > { %v698_v41 = vpop.xlane.xlu0 %697 }
 0x248   : > { %v715_v25 = vsel %vm667_vm7, %v698_v41, 0.0 }
 0x249   : > { %v1049_v44 = vpop.xlane.xlu2 %1048  ;;  %v789_v12 = vperm.slane %v715_v25, %v2408_v33 }
 0x24a   : > { %v1050_v42 = vcvt.f32.s32 %v1049_v44 }
 0x24b   : > { %v791_v7 = vsel %vm2612_vm12, %v789_v12, %v787_v30 }
 0x24c   : > { %v1053_v4 = vadd.s32 %v1052_v32, %v1050_v42  ;;  %v795_v54 = vsel %vm794_vm9, %v793_v58, %v791_v7 }
 0x24d   : > { %797 = vst [vmem:[%s249_s20] sm:$0x1] %v795_v54 }
 0x24e   : > { %v1083_v11 = vperm.slane %v1053_v4, %v792_v51 }
 0x24f   : > { %1509 = shalt.err (!%p1506_p0)
}
 0x250   : > { %1260 = dma.vmem_to_hbm [thread:$0]  (%p1660_p9), %s1102_s26, 16, %s1104_s11, %s1087_s17   ;;  %v1084_v33 = vsel %vm794_vm9, %v1083_v11, %v2414_v43 }
 0x251   : > { %1085 = vst [vmem:[%s255_s28] sm:$0x1] %v1084_v33  ;;  %s1091_s30 = scalar_lea.sflag [#allocation9], %s1766_s7  ;;  %s1524_s29 = sshra.s32 %s1117_s9, 4  ;;  %s1525_s29 = int_to_ptr.hbm [resolvable:$true] %s1524_s29 }
 0x252   : > { %s1526_s6 = scalar_lea.hbm %s1525_s29, 1  ;;  %s1530_s8 = scalar_lea.hbm %s2558_s3, 3 }
 0x253   : > { %p1527_p1 = scmp.ne.s32.totalorder %s1525_s29, %s1526_s6  ;;  %p1531_p2 = scmp.lt.s32.totalorder %s1525_s29, %s2558_s3 }
 0x254   : > { %p1532_p3 = scmp.lt.s32.totalorder %s1530_s8, %s1526_s6 }
 0x255   : > { %p1528_p10 = pnand %p1527_p1, %p1660_p9 }
 0x256   : > { %p1533_p4 = por %p1532_p3, %p1531_p2 }
 0x257   : > { %p1529_p13 = pneg %p1528_p10 }
 0x259   : > { %p1534_p6 = pnand %p1533_p4, %p1529_p13 }
 0x25b   : > { %1537 = shalt.err (!%p1534_p6)
}
 0x25c   : > { %1261 = dma.vmem_to_hbm [thread:$0]  (%p1660_p9), %s1115_s16, 16, %s1117_s9, %s1091_s30  }
 0x25d PF: > { %p1271_p5 = scmp.ge.s32.totalorder %s1584_s15, 2  ;;  %s1128_s7 = sand.u32 1, %s1572_s12  }
 0x25e   : > { %p2613_p7 = scmp.ne.s32.totalorder %s2580_s25, 0  ;;  %s1129_s26 = scalar_lea.sflag [#allocation4], %s1128_s7 }
 0x260   : > { %p1265_p8 = pnand %p1271_p5, %p2613_p7 }
 0x262   : > { %p1266_p11 = pneg %p1265_p8 }
 0x264   : > { %1563 = dma.done.wait (%p1266_p11), %s1129_s26, 16  }
 0x265   : > { %1565 = vsyncadd (%p1266_p11), %s1129_s26, 4294967280  ;;  %s1138_s11 = scalar_lea.sflag [#allocation9], %s1128_s7 }
 0x266   : > { %1567 = dma.done.wait (%p1266_p11), %s1138_s11, 16  }
 0x267   : > { %1569 = vsyncadd (%p1266_p11), %s1138_s11, 4294967280  ;;  %p23_p9 = scmp.ge.s32.totalorder %s1637_s18, 5   ;;  %s2614_s12 = smov %s1576_s13 }
 0x268   : > { %s2615_s13 = smov %s1580_s14  ;;  %s2616_s14 = smov %s1649_s21 }
 0x269   : > { %s2617_s15 = smov %s1637_s18  ;;  %25 = sbr.rel (!%p23_p9) target bundleno = 9 (0x9), region = 103 }
 0x26e   :  { %1143 = vsyncpa [#allocation3], 1 }
 0x26f   :  { %1145 = vsyncpa [#allocation3 + $0x1], 1 }
 0x270   :  { %1146 = vsyncpa [#allocation6], 1 }
 0x271   :  { %1148 = vsyncpa [#allocation6 + $0x1], 1 }
 0x272   :  { %1149 = vsyncpa [#allocation4], 1 }
 0x273   :  { %1151 = vsyncpa [#allocation4 + $0x1], 1 }
 0x274   :  { %1152 = vsyncpa [#allocation9], 1 }
 0x275   :  { %1154 = vsyncpa [#allocation9 + $0x1], 1 }

</bundles_post_ra>
